<compile_context>
chip_gen: v7x
topology: tpu7x:2x2x1
jax: 0.10.0
libtpu: 0.0.40
codegen_flags: <defaults>
</compile_context>

<pallas_src>
from functools import partial

import jax
import jax.numpy as jnp
from jax import lax
from jax.experimental import pallas as pl
from jax.experimental.pallas import tpu as pltpu

CLAMP = 1.4           # module-level `clamp` in the reference code
ATAN_FACTOR = 0.636   # FrEIA GLOWCouplingBlock constant (~2/pi)
_LOG_SCALE = CLAMP * ATAN_FACTOR


def _atan(x):
    # arctan from ops with guaranteed Mosaic lowerings (mul/add/rsqrt/recip).
    # Two half-angle reductions  atan(x) = 2*atan(x*r/(1+r)),  r = rsqrt(1+x^2),
    # bring |y| <= tan(pi/8) ~ 0.4142, then an odd Taylor series through y^13.
    # Abs error <= ~5e-7, well below the 1e-4 tolerance.
    # NOTE: x*x overflows for |x| >~ 1.8e19 (implausible for activations).
    y = x
    for _ in range(2):
        r = lax.rsqrt(1.0 + y * y)
        d = 1.0 + r
        inv = pl.reciprocal(d, approx=True)
        inv = inv * (2.0 - d * inv)       # one Newton step -> ~f32 exact
        y = y * r * inv
    y2 = y * y
    p = 1.0 / 13.0
    p = p * y2 - 1.0 / 11.0
    p = p * y2 + 1.0 / 9.0
    p = p * y2 - 1.0 / 7.0
    p = p * y2 + 1.0 / 5.0
    p = p * y2 - 1.0 / 3.0
    p = p * y2 + 1.0
    return 4.0 * (y * p)


def _einv(s):
    # 1 / e(s) computed as exp(-clamp*0.636*atan(s/clamp)): multiply instead of
    # divide on the serial chain (identical in exact arithmetic).
    return jnp.exp((-_LOG_SCALE) * _atan(s * (1.0 / CLAMP)))


def det_layer_kernel(num_layers, l1, H,
                     x_ref, c_ref,
                     w1c_ref, b1_ref, w1x1_ref, w1x2_ref, w2_ref, b2_ref,
                     w31_ref, b31_ref, w32_ref, b32_ref,
                     y_ref):
    # Feature-major layout: activations are (features, TB); batch lives on lanes.
    x1 = x_ref[:l1, :]
    x2 = x_ref[l1:, :]
    c = c_ref[...]

    # Hoisted condition projection for every layer and both subnets, with the
    # first-Linear bias folded in: one (2*L*H, dcond) @ (dcond, TB) matmul plus
    # one broadcast add, both off the per-layer critical path.
    cc = jnp.dot(w1c_ref[...], c, preferred_element_type=jnp.float32) + b1_ref[...]

    # forward() calls the ReversibleGraphNet with rev=True: coupling blocks are
    # traversed in reverse node order and each block runs its inverse.
    for i in range(num_layers - 1, -1, -1):
        cc1 = cc[(2 * i) * H:(2 * i + 1) * H, :]      # free sublane views (mult. of 32)
        cc2 = cc[(2 * i + 1) * H:(2 * i + 2) * H, :]

        # subnet s1 applied to x1 (input concat with cond folded via cc1)
        h = jnp.maximum(
            jnp.dot(w1x1_ref[i], x1, preferred_element_type=jnp.float32) + cc1, 0.0)
        h = jnp.maximum(
            jnp.dot(w2_ref[2 * i], h, preferred_element_type=jnp.float32)
            + b2_ref[2 * i], 0.0)
        st = jnp.dot(w31_ref[i], h, preferred_element_type=jnp.float32) + b31_ref[i]
        l2 = st.shape[0] // 2
        s1v, t1 = st[:l2, :], st[l2:, :]
        x2 = (x2 - t1) * _einv(s1v)

        # subnet s2 applied to the freshly computed x2 half
        h = jnp.maximum(
            jnp.dot(w1x2_ref[i], x2, preferred_element_type=jnp.float32) + cc2, 0.0)
        h = jnp.maximum(
            jnp.dot(w2_ref[2 * i + 1], h, preferred_element_type=jnp.float32)
            + b2_ref[2 * i + 1], 0.0)
        st = jnp.dot(w32_ref[i], h, preferred_element_type=jnp.float32) + b32_ref[i]
        s2v, t2 = st[:l1, :], st[l1:, :]
        x1 = (x1 - t2) * _einv(s2v)

    # Two sublane-slice stores; both full-lane (unmasked) along TB.
    y_ref[:l1, :] = x1
    y_ref[l1:, :] = x2


_PARAM_ORDER = [
    "w1c_all", "b1_all", "w1x_s1", "w1x_s2", "w2_all", "b2_all",
    "w3_s1", "b3_s1", "w3_s2", "b3_s2",
]


def _round_up(n, m):
    return ((n + m - 1) // m) * m


def _const_map(ndim):
    return lambda b: (0,) * ndim


def deterministic_layer_forward(x, c, params, *, batch_tile=1024):
    """Pallas equivalent of deterministic_layer.forward(xs, c) (rev=True pass)."""
    B, D = x.shape
    dcond = c.shape[1]
    l1 = D // 2
    L = params["w1x_s1"].shape[0]
    H = params["w1x_s1"].shape[1]

    # Batch-on-lanes tiling: pad B to a multiple of 128, keep TB a multiple of
    # 128, and keep >= 2 grid steps for large batches so v7x's two TensorCores
    # both engage ("parallel" grid axis).  Padded columns are zeros and flow
    # through atan/exp harmlessly (discarded after the call).
    pB = _round_up(B, 128)
    TB = min(batch_tile, _round_up(pl.cdiv(pB, 2), 128))
    pB = _round_up(pB, TB)

    xt = jnp.pad(x.astype(jnp.float32).T, ((0, 0), (0, pB - B)))   # (D, pB)
    ct = jnp.pad(c.astype(jnp.float32).T, ((0, 0), (0, pB - B)))   # (dcond, pB)

    weights = [params[n] for n in _PARAM_ORDER]
    in_specs = [
        pl.BlockSpec((D, TB), lambda b: (0, b)),
        pl.BlockSpec((dcond, TB), lambda b: (0, b)),
    ] + [pl.BlockSpec(w.shape, _const_map(w.ndim)) for w in weights]

    y = pl.pallas_call(
        partial(det_layer_kernel, L, l1, H),
        out_shape=jax.ShapeDtypeStruct((D, pB), jnp.float32),
        grid=(pB // TB,),
        in_specs=in_specs,
        out_specs=pl.BlockSpec((D, TB), lambda b: (0, b)),
        compiler_params=pltpu.CompilerParams(
            dimension_semantics=("parallel",)),
    )(xt, ct, *weights)
    return y[:, :B].T


def init_params(key, num_inn_layers, sub_net_size, dim, dim_cond):
    """Deterministic synthetic init, packed in the kernel's feature-major layout."""
    l1 = dim // 2
    l2 = dim - l1
    H = sub_net_size

    def linear(k, fan_in, fan_out):
        kw, kb = jax.random.split(k)
        bound = 1.0 / float(fan_in) ** 0.5
        W = jax.random.uniform(kw, (fan_out, fan_in), jnp.float32, -bound, bound)
        b = jax.random.uniform(kb, (fan_out,), jnp.float32, -bound, bound)
        return W, b

    w1c_rows, b1_rows = [], []
    w1x_s1, w1x_s2 = [], []
    w2_all, b2_all = [], []
    w3_s1, b3_s1, w3_s2, b3_s2 = [], [], [], []
    for _ in range(num_inn_layers):
        key, k1, k2, k3, k4, k5, k6 = jax.random.split(key, 7)
        # s1 : (l1 + dim_cond) -> H -> H -> 2*l2
        w1a, b1a = linear(k1, l1 + dim_cond, H)
        w2a, b2a = linear(k2, H, H)
        w3a, b3a = linear(k3, H, 2 * l2)
        # s2 : (l2 + dim_cond) -> H -> H -> 2*l1
        w1b, b1b = linear(k4, l2 + dim_cond, H)
        w2b, b2b = linear(k5, H, H)
        w3b, b3b = linear(k6, H, 2 * l1)

        w1x_s1.append(w1a[:, :l1])                 # (H, l1)
        w1x_s2.append(w1b[:, :l2])                 # (H, l2)
        w1c_rows += [w1a[:, l1:], w1b[:, l2:]]     # per layer: [s1, s2]
        b1_rows += [b1a, b1b]
        w2_all += [w2a, w2b]
        b2_all += [b2a[:, None], b2b[:, None]]
        w3_s1.append(w3a); b3_s1.append(b3a[:, None])
        w3_s2.append(w3b); b3_s2.append(b3b[:, None])

    return {
        "w1c_all": jnp.concatenate(w1c_rows, axis=0),         # (2*L*H, dcond)
        "b1_all": jnp.concatenate(b1_rows, axis=0)[:, None],  # (2*L*H, 1)
        "w1x_s1": jnp.stack(w1x_s1),                          # (L, H, l1)
        "w1x_s2": jnp.stack(w1x_s2),                          # (L, H, l2)
        "w2_all": jnp.stack(w2_all),                          # (2L, H, H)
        "b2_all": jnp.stack(b2_all),                          # (2L, H, 1)
        "w3_s1": jnp.stack(w3_s1),                            # (L, 2*l2, H)
        "b3_s1": jnp.stack(b3_s1),                            # (L, 2*l2, 1)
        "w3_s2": jnp.stack(w3_s2),                            # (L, 2*l1, H)
        "b3_s2": jnp.stack(b3_s2),                            # (L, 2*l1, 1)
    }


def reference_forward(x, c, params):
    """Pure-JAX reference (jnp.arctan, explicit divide) for correctness checks."""
    B, D = x.shape
    l1 = D // 2
    l2 = D - l1
    L, H, _ = params["w1x_s1"].shape
    x1, x2 = x[:, :l1], x[:, l1:]

    def e_ref(s):
        return jnp.exp(CLAMP * ATAN_FACTOR * jnp.arctan(s / CLAMP))

    cc = c @ params["w1c_all"].T + params["b1_all"][:, 0]
    for i in range(L - 1, -1, -1):
        cc1 = cc[:, (2 * i) * H:(2 * i + 1) * H]
        cc2 = cc[:, (2 * i + 1) * H:(2 * i + 2) * H]
        h = jax.nn.relu(x1 @ params["w1x_s1"][i].T + cc1)
        h = jax.nn.relu(h @ params["w2_all"][2 * i].T + params["b2_all"][2 * i, :, 0])
        st = h @ params["w3_s1"][i].T + params["b3_s1"][i, :, 0]
        s1v, t1 = st[:, :l2], st[:, l2:]
        x2 = (x2 - t1) / e_ref(s1v)
        h = jax.nn.relu(x2 @ params["w1x_s2"][i].T + cc2)
        h = jax.nn.relu(h @ params["w2_all"][2 * i + 1].T + params["b2_all"][2 * i + 1, :, 0])
        st = h @ params["w3_s2"][i].T + params["b3_s2"][i, :, 0]
        s2v, t2 = st[:, :l1], st[:, l1:]
        x1 = (x1 - t2) / e_ref(s2v)
    return jnp.concatenate([x1, x2], axis=1)


if __name__ == "__main__":
    # Shapes consistent with the module defaults:
    #   dimension=5, dimension_condition=5, sub_net_size=32, num_inn_layers=3
    batch, dim, dim_cond, sub_net_size, num_inn_layers = 8, 5, 5, 32, 3

    key = jax.random.PRNGKey(0)
    kx, kc, kp = jax.random.split(key, 3)
    xs = jax.random.normal(kx, (batch, dim), jnp.float32)
    cond = jax.random.normal(kc, (batch, dim_cond), jnp.float32)
    params = init_params(kp, num_inn_layers, sub_net_size, dim, dim_cond)

    out = deterministic_layer_forward(xs, cond, params)
    out = jax.block_until_ready(out)

    ref = reference_forward(xs, cond, params)
    assert out.shape == (batch, dim)
    assert bool(jnp.allclose(out, ref, atol=1e-4, rtol=1e-4)), "mismatch vs reference"
    print("KERNEL_OK")
</pallas_src>

<mosaic_0001>
module attributes {stable_mosaic.version = 11 : i64} {
  func.func @det_layer_kernel(%arg0: i32, %arg1: memref<5x128xf32, #tpu.memory_space<vmem>>, %arg2: memref<5x128xf32, #tpu.memory_space<vmem>>, %arg3: memref<192x5xf32, #tpu.memory_space<vmem>>, %arg4: memref<192x1xf32, #tpu.memory_space<vmem>>, %arg5: memref<3x32x2xf32, #tpu.memory_space<vmem>>, %arg6: memref<3x32x3xf32, #tpu.memory_space<vmem>>, %arg7: memref<6x32x32xf32, #tpu.memory_space<vmem>>, %arg8: memref<6x32x1xf32, #tpu.memory_space<vmem>>, %arg9: memref<3x6x32xf32, #tpu.memory_space<vmem>>, %arg10: memref<3x6x1xf32, #tpu.memory_space<vmem>>, %arg11: memref<3x4x32xf32, #tpu.memory_space<vmem>>, %arg12: memref<3x4x1xf32, #tpu.memory_space<vmem>>, %arg13: memref<5x128xf32, #tpu.memory_space<vmem>>) attributes {dimension_semantics = [#tpu.dimension_semantics<parallel>], iteration_bounds = array<i64: 1>, scalar_prefetch = 0 : i64, scratch_operands = 0 : i64, tpu.core_type = #tpu.core_type<tc>, window_params = [{transform_indices = @transform_0, window_bounds = array<i64: 5, 128>}, {transform_indices = @transform_1, window_bounds = array<i64: 5, 128>}, {pipeline_mode = #tpu.pipeline_mode<synchronous>, transform_indices = @transform_2, window_bounds = array<i64: 192, 5>}, {pipeline_mode = #tpu.pipeline_mode<synchronous>, transform_indices = @transform_3, window_bounds = array<i64: 192, 1>}, {pipeline_mode = #tpu.pipeline_mode<synchronous>, transform_indices = @transform_4, window_bounds = array<i64: 3, 32, 2>}, {pipeline_mode = #tpu.pipeline_mode<synchronous>, transform_indices = @transform_5, window_bounds = array<i64: 3, 32, 3>}, {pipeline_mode = #tpu.pipeline_mode<synchronous>, transform_indices = @transform_6, window_bounds = array<i64: 6, 32, 32>}, {pipeline_mode = #tpu.pipeline_mode<synchronous>, transform_indices = @transform_7, window_bounds = array<i64: 6, 32, 1>}, {pipeline_mode = #tpu.pipeline_mode<synchronous>, transform_indices = @transform_8, window_bounds = array<i64: 3, 6, 32>}, {pipeline_mode = #tpu.pipeline_mode<synchronous>, transform_indices = @transform_9, window_bounds = array<i64: 3, 6, 1>}, {pipeline_mode = #tpu.pipeline_mode<synchronous>, transform_indices = @transform_10, window_bounds = array<i64: 3, 4, 32>}, {pipeline_mode = #tpu.pipeline_mode<synchronous>, transform_indices = @transform_11, window_bounds = array<i64: 3, 4, 1>}, {transform_indices = @transform_12, window_bounds = array<i64: 5, 128>}]} {
    %c0 = arith.constant 0 : index
    %c0_0 = arith.constant 0 : index
    %0 = vector.load %arg1[%c0, %c0_0] : memref<5x128xf32, #tpu.memory_space<vmem>>, vector<2x128xf32>
    %c2 = arith.constant 2 : index
    %c0_1 = arith.constant 0 : index
    %1 = vector.load %arg1[%c2, %c0_1] : memref<5x128xf32, #tpu.memory_space<vmem>>, vector<3x128xf32>
    %c0_2 = arith.constant 0 : index
    %c0_3 = arith.constant 0 : index
    %2 = vector.load %arg2[%c0_2, %c0_3] : memref<5x128xf32, #tpu.memory_space<vmem>>, vector<5x128xf32>
    %c0_4 = arith.constant 0 : index
    %c0_5 = arith.constant 0 : index
    %3 = vector.load %arg3[%c0_4, %c0_5] : memref<192x5xf32, #tpu.memory_space<vmem>>, vector<192x5xf32>
    %cst = arith.constant dense<0.000000e+00> : vector<192x128xf32>
    %4 = tpu.matmul %3, %2, %cst {dimension_numbers = #tpu.dot_dimension_numbers<[1], [0], [0], [1], [0, 0, 1, 1], [], []>} : vector<192x5xf32>, vector<5x128xf32>, vector<192x128xf32> -> vector<192x128xf32>
    %c0_6 = arith.constant 0 : index
    %c0_7 = arith.constant 0 : index
    %5 = vector.load %arg4[%c0_6, %c0_7] : memref<192x1xf32, #tpu.memory_space<vmem>>, vector<192x1xf32>
    %6 = vector.broadcast %5 : vector<192x1xf32> to vector<192x128xf32>
    %7 = arith.addf %4, %6 : vector<192x128xf32>
    %8 = vector.extract_strided_slice %7 {offsets = [128, 0], sizes = [32, 128], strides = [1, 1]} : vector<192x128xf32> to vector<32x128xf32>
    %9 = vector.extract_strided_slice %7 {offsets = [160, 0], sizes = [32, 128], strides = [1, 1]} : vector<192x128xf32> to vector<32x128xf32>
    %c2_8 = arith.constant 2 : index
    %c0_9 = arith.constant 0 : index
    %c0_10 = arith.constant 0 : index
    %10 = vector.load %arg5[%c2_8, %c0_9, %c0_10] : memref<3x32x2xf32, #tpu.memory_space<vmem>>, vector<1x32x2xf32>
    %11 = vector.shape_cast %10 : vector<1x32x2xf32> to vector<32x2xf32>
    %cst_11 = arith.constant dense<0.000000e+00> : vector<32x128xf32>
    %12 = tpu.matmul %11, %0, %cst_11 {dimension_numbers = #tpu.dot_dimension_numbers<[1], [0], [0], [1], [0, 0, 1, 1], [], []>} : vector<32x2xf32>, vector<2x128xf32>, vector<32x128xf32> -> vector<32x128xf32>
    %13 = arith.addf %12, %8 : vector<32x128xf32>
    %cst_12 = arith.constant 0.000000e+00 : f32
    %14 = vector.broadcast %cst_12 : f32 to vector<32x128xf32>
    %15 = arith.maximumf %13, %14 : vector<32x128xf32>
    %c4 = arith.constant 4 : index
    %c0_13 = arith.constant 0 : index
    %c0_14 = arith.constant 0 : index
    %16 = vector.load %arg7[%c4, %c0_13, %c0_14] : memref<6x32x32xf32, #tpu.memory_space<vmem>>, vector<1x32x32xf32>
    %17 = vector.shape_cast %16 : vector<1x32x32xf32> to vector<32x32xf32>
    %cst_15 = arith.constant dense<0.000000e+00> : vector<32x128xf32>
    %18 = tpu.matmul %17, %15, %cst_15 {dimension_numbers = #tpu.dot_dimension_numbers<[1], [0], [0], [1], [0, 0, 1, 1], [], []>} : vector<32x32xf32>, vector<32x128xf32>, vector<32x128xf32> -> vector<32x128xf32>
    %c4_16 = arith.constant 4 : index
    %c0_17 = arith.constant 0 : index
    %c0_18 = arith.constant 0 : index
    %19 = vector.load %arg8[%c4_16, %c0_17, %c0_18] : memref<6x32x1xf32, #tpu.memory_space<vmem>>, vector<1x32x1xf32>
    %20 = vector.shape_cast %19 : vector<1x32x1xf32> to vector<32x1xf32>
    %21 = vector.broadcast %20 : vector<32x1xf32> to vector<32x128xf32>
    %22 = arith.addf %18, %21 : vector<32x128xf32>
    %cst_19 = arith.constant 0.000000e+00 : f32
    %23 = vector.broadcast %cst_19 : f32 to vector<32x128xf32>
    %24 = arith.maximumf %22, %23 : vector<32x128xf32>
    %c2_20 = arith.constant 2 : index
    %c0_21 = arith.constant 0 : index
    %c0_22 = arith.constant 0 : index
    %25 = vector.load %arg9[%c2_20, %c0_21, %c0_22] : memref<3x6x32xf32, #tpu.memory_space<vmem>>, vector<1x6x32xf32>
    %26 = vector.shape_cast %25 : vector<1x6x32xf32> to vector<6x32xf32>
    %cst_23 = arith.constant dense<0.000000e+00> : vector<6x128xf32>
    %27 = tpu.matmul %26, %24, %cst_23 {dimension_numbers = #tpu.dot_dimension_numbers<[1], [0], [0], [1], [0, 0, 1, 1], [], []>} : vector<6x32xf32>, vector<32x128xf32>, vector<6x128xf32> -> vector<6x128xf32>
    %c2_24 = arith.constant 2 : index
    %c0_25 = arith.constant 0 : index
    %c0_26 = arith.constant 0 : index
    %28 = vector.load %arg10[%c2_24, %c0_25, %c0_26] : memref<3x6x1xf32, #tpu.memory_space<vmem>>, vector<1x6x1xf32>
    %29 = vector.shape_cast %28 : vector<1x6x1xf32> to vector<6x1xf32>
    %30 = vector.broadcast %29 : vector<6x1xf32> to vector<6x128xf32>
    %31 = arith.addf %27, %30 : vector<6x128xf32>
    %32 = vector.extract_strided_slice %31 {offsets = [0, 0], sizes = [3, 128], strides = [1, 1]} : vector<6x128xf32> to vector<3x128xf32>
    %33 = vector.extract_strided_slice %31 {offsets = [3, 0], sizes = [3, 128], strides = [1, 1]} : vector<6x128xf32> to vector<3x128xf32>
    %34 = arith.subf %1, %33 : vector<3x128xf32>
    %cst_27 = arith.constant 0.714285731 : f32
    %35 = vector.broadcast %cst_27 : f32 to vector<3x128xf32>
    %36 = arith.mulf %32, %35 : vector<3x128xf32>
    %37 = arith.mulf %36, %36 : vector<3x128xf32>
    %cst_28 = arith.constant 1.000000e+00 : f32
    %38 = vector.broadcast %cst_28 : f32 to vector<3x128xf32>
    %39 = arith.addf %38, %37 : vector<3x128xf32>
    %40 = math.rsqrt %39 : vector<3x128xf32>
    %cst_29 = arith.constant 1.000000e+00 : f32
    %41 = vector.broadcast %cst_29 : f32 to vector<3x128xf32>
    %42 = arith.addf %41, %40 : vector<3x128xf32>
    %43 = tpu.reciprocal %42 {approx = true} : vector<3x128xf32> -> vector<3x128xf32>
    %44 = arith.mulf %42, %43 : vector<3x128xf32>
    %cst_30 = arith.constant 2.000000e+00 : f32
    %45 = vector.broadcast %cst_30 : f32 to vector<3x128xf32>
    %46 = arith.subf %45, %44 : vector<3x128xf32>
    %47 = arith.mulf %43, %46 : vector<3x128xf32>
    %48 = arith.mulf %36, %40 : vector<3x128xf32>
    %49 = arith.mulf %48, %47 : vector<3x128xf32>
    %50 = arith.mulf %49, %49 : vector<3x128xf32>
    %cst_31 = arith.constant 1.000000e+00 : f32
    %51 = vector.broadcast %cst_31 : f32 to vector<3x128xf32>
    %52 = arith.addf %51, %50 : vector<3x128xf32>
    %53 = math.rsqrt %52 : vector<3x128xf32>
    %cst_32 = arith.constant 1.000000e+00 : f32
    %54 = vector.broadcast %cst_32 : f32 to vector<3x128xf32>
    %55 = arith.addf %54, %53 : vector<3x128xf32>
    %56 = tpu.reciprocal %55 {approx = true} : vector<3x128xf32> -> vector<3x128xf32>
    %57 = arith.mulf %55, %56 : vector<3x128xf32>
    %cst_33 = arith.constant 2.000000e+00 : f32
    %58 = vector.broadcast %cst_33 : f32 to vector<3x128xf32>
    %59 = arith.subf %58, %57 : vector<3x128xf32>
    %60 = arith.mulf %56, %59 : vector<3x128xf32>
    %61 = arith.mulf %49, %53 : vector<3x128xf32>
    %62 = arith.mulf %61, %60 : vector<3x128xf32>
    %63 = arith.mulf %62, %62 : vector<3x128xf32>
    %cst_34 = arith.constant 0.0769230798 : f32
    %64 = vector.broadcast %cst_34 : f32 to vector<3x128xf32>
    %65 = arith.mulf %64, %63 : vector<3x128xf32>
    %cst_35 = arith.constant 0.0909090936 : f32
    %66 = vector.broadcast %cst_35 : f32 to vector<3x128xf32>
    %67 = arith.subf %65, %66 : vector<3x128xf32>
    %68 = arith.mulf %67, %63 : vector<3x128xf32>
    %cst_36 = arith.constant 0.111111112 : f32
    %69 = vector.broadcast %cst_36 : f32 to vector<3x128xf32>
    %70 = arith.addf %68, %69 : vector<3x128xf32>
    %71 = arith.mulf %70, %63 : vector<3x128xf32>
    %cst_37 = arith.constant 0.142857149 : f32
    %72 = vector.broadcast %cst_37 : f32 to vector<3x128xf32>
    %73 = arith.subf %71, %72 : vector<3x128xf32>
    %74 = arith.mulf %73, %63 : vector<3x128xf32>
    %cst_38 = arith.constant 2.000000e-01 : f32
    %75 = vector.broadcast %cst_38 : f32 to vector<3x128xf32>
    %76 = arith.addf %74, %75 : vector<3x128xf32>
    %77 = arith.mulf %76, %63 : vector<3x128xf32>
    %cst_39 = arith.constant 0.333333343 : f32
    %78 = vector.broadcast %cst_39 : f32 to vector<3x128xf32>
    %79 = arith.subf %77, %78 : vector<3x128xf32>
    %80 = arith.mulf %79, %63 : vector<3x128xf32>
    %cst_40 = arith.constant 1.000000e+00 : f32
    %81 = vector.broadcast %cst_40 : f32 to vector<3x128xf32>
    %82 = arith.addf %80, %81 : vector<3x128xf32>
    %83 = arith.mulf %62, %82 : vector<3x128xf32>
    %cst_41 = arith.constant 4.000000e+00 : f32
    %84 = vector.broadcast %cst_41 : f32 to vector<3x128xf32>
    %85 = arith.mulf %84, %83 : vector<3x128xf32>
    %cst_42 = arith.constant -0.890399992 : f32
    %86 = vector.broadcast %cst_42 : f32 to vector<3x128xf32>
    %87 = arith.mulf %86, %85 : vector<3x128xf32>
    %88 = math.exp %87 : vector<3x128xf32>
    %89 = arith.mulf %34, %88 : vector<3x128xf32>
    %c2_43 = arith.constant 2 : index
    %c0_44 = arith.constant 0 : index
    %c0_45 = arith.constant 0 : index
    %90 = vector.load %arg6[%c2_43, %c0_44, %c0_45] : memref<3x32x3xf32, #tpu.memory_space<vmem>>, vector<1x32x3xf32>
    %91 = vector.shape_cast %90 : vector<1x32x3xf32> to vector<32x3xf32>
    %cst_46 = arith.constant dense<0.000000e+00> : vector<32x128xf32>
    %92 = tpu.matmul %91, %89, %cst_46 {dimension_numbers = #tpu.dot_dimension_numbers<[1], [0], [0], [1], [0, 0, 1, 1], [], []>} : vector<32x3xf32>, vector<3x128xf32>, vector<32x128xf32> -> vector<32x128xf32>
    %93 = arith.addf %92, %9 : vector<32x128xf32>
    %cst_47 = arith.constant 0.000000e+00 : f32
    %94 = vector.broadcast %cst_47 : f32 to vector<32x128xf32>
    %95 = arith.maximumf %93, %94 : vector<32x128xf32>
    %c5 = arith.constant 5 : index
    %c0_48 = arith.constant 0 : index
    %c0_49 = arith.constant 0 : index
    %96 = vector.load %arg7[%c5, %c0_48, %c0_49] : memref<6x32x32xf32, #tpu.memory_space<vmem>>, vector<1x32x32xf32>
    %97 = vector.shape_cast %96 : vector<1x32x32xf32> to vector<32x32xf32>
    %cst_50 = arith.constant dense<0.000000e+00> : vector<32x128xf32>
    %98 = tpu.matmul %97, %95, %cst_50 {dimension_numbers = #tpu.dot_dimension_numbers<[1], [0], [0], [1], [0, 0, 1, 1], [], []>} : vector<32x32xf32>, vector<32x128xf32>, vector<32x128xf32> -> vector<32x128xf32>
    %c5_51 = arith.constant 5 : index
    %c0_52 = arith.constant 0 : index
    %c0_53 = arith.constant 0 : index
    %99 = vector.load %arg8[%c5_51, %c0_52, %c0_53] : memref<6x32x1xf32, #tpu.memory_space<vmem>>, vector<1x32x1xf32>
    %100 = vector.shape_cast %99 : vector<1x32x1xf32> to vector<32x1xf32>
    %101 = vector.broadcast %100 : vector<32x1xf32> to vector<32x128xf32>
    %102 = arith.addf %98, %101 : vector<32x128xf32>
    %cst_54 = arith.constant 0.000000e+00 : f32
    %103 = vector.broadcast %cst_54 : f32 to vector<32x128xf32>
    %104 = arith.maximumf %102, %103 : vector<32x128xf32>
    %c2_55 = arith.constant 2 : index
    %c0_56 = arith.constant 0 : index
    %c0_57 = arith.constant 0 : index
    %105 = vector.load %arg11[%c2_55, %c0_56, %c0_57] : memref<3x4x32xf32, #tpu.memory_space<vmem>>, vector<1x4x32xf32>
    %106 = vector.shape_cast %105 : vector<1x4x32xf32> to vector<4x32xf32>
    %cst_58 = arith.constant dense<0.000000e+00> : vector<4x128xf32>
    %107 = tpu.matmul %106, %104, %cst_58 {dimension_numbers = #tpu.dot_dimension_numbers<[1], [0], [0], [1], [0, 0, 1, 1], [], []>} : vector<4x32xf32>, vector<32x128xf32>, vector<4x128xf32> -> vector<4x128xf32>
    %c2_59 = arith.constant 2 : index
    %c0_60 = arith.constant 0 : index
    %c0_61 = arith.constant 0 : index
    %108 = vector.load %arg12[%c2_59, %c0_60, %c0_61] : memref<3x4x1xf32, #tpu.memory_space<vmem>>, vector<1x4x1xf32>
    %109 = vector.shape_cast %108 : vector<1x4x1xf32> to vector<4x1xf32>
    %110 = vector.broadcast %109 : vector<4x1xf32> to vector<4x128xf32>
    %111 = arith.addf %107, %110 : vector<4x128xf32>
    %112 = vector.extract_strided_slice %111 {offsets = [0, 0], sizes = [2, 128], strides = [1, 1]} : vector<4x128xf32> to vector<2x128xf32>
    %113 = vector.extract_strided_slice %111 {offsets = [2, 0], sizes = [2, 128], strides = [1, 1]} : vector<4x128xf32> to vector<2x128xf32>
    %114 = arith.subf %0, %113 : vector<2x128xf32>
    %cst_62 = arith.constant 0.714285731 : f32
    %115 = vector.broadcast %cst_62 : f32 to vector<2x128xf32>
    %116 = arith.mulf %112, %115 : vector<2x128xf32>
    %117 = arith.mulf %116, %116 : vector<2x128xf32>
    %cst_63 = arith.constant 1.000000e+00 : f32
    %118 = vector.broadcast %cst_63 : f32 to vector<2x128xf32>
    %119 = arith.addf %118, %117 : vector<2x128xf32>
    %120 = math.rsqrt %119 : vector<2x128xf32>
    %cst_64 = arith.constant 1.000000e+00 : f32
    %121 = vector.broadcast %cst_64 : f32 to vector<2x128xf32>
    %122 = arith.addf %121, %120 : vector<2x128xf32>
    %123 = tpu.reciprocal %122 {approx = true} : vector<2x128xf32> -> vector<2x128xf32>
    %124 = arith.mulf %122, %123 : vector<2x128xf32>
    %cst_65 = arith.constant 2.000000e+00 : f32
    %125 = vector.broadcast %cst_65 : f32 to vector<2x128xf32>
    %126 = arith.subf %125, %124 : vector<2x128xf32>
    %127 = arith.mulf %123, %126 : vector<2x128xf32>
    %128 = arith.mulf %116, %120 : vector<2x128xf32>
    %129 = arith.mulf %128, %127 : vector<2x128xf32>
    %130 = arith.mulf %129, %129 : vector<2x128xf32>
    %cst_66 = arith.constant 1.000000e+00 : f32
    %131 = vector.broadcast %cst_66 : f32 to vector<2x128xf32>
    %132 = arith.addf %131, %130 : vector<2x128xf32>
    %133 = math.rsqrt %132 : vector<2x128xf32>
    %cst_67 = arith.constant 1.000000e+00 : f32
    %134 = vector.broadcast %cst_67 : f32 to vector<2x128xf32>
    %135 = arith.addf %134, %133 : vector<2x128xf32>
    %136 = tpu.reciprocal %135 {approx = true} : vector<2x128xf32> -> vector<2x128xf32>
    %137 = arith.mulf %135, %136 : vector<2x128xf32>
    %cst_68 = arith.constant 2.000000e+00 : f32
    %138 = vector.broadcast %cst_68 : f32 to vector<2x128xf32>
    %139 = arith.subf %138, %137 : vector<2x128xf32>
    %140 = arith.mulf %136, %139 : vector<2x128xf32>
    %141 = arith.mulf %129, %133 : vector<2x128xf32>
    %142 = arith.mulf %141, %140 : vector<2x128xf32>
    %143 = arith.mulf %142, %142 : vector<2x128xf32>
    %cst_69 = arith.constant 0.0769230798 : f32
    %144 = vector.broadcast %cst_69 : f32 to vector<2x128xf32>
    %145 = arith.mulf %144, %143 : vector<2x128xf32>
    %cst_70 = arith.constant 0.0909090936 : f32
    %146 = vector.broadcast %cst_70 : f32 to vector<2x128xf32>
    %147 = arith.subf %145, %146 : vector<2x128xf32>
    %148 = arith.mulf %147, %143 : vector<2x128xf32>
    %cst_71 = arith.constant 0.111111112 : f32
    %149 = vector.broadcast %cst_71 : f32 to vector<2x128xf32>
    %150 = arith.addf %148, %149 : vector<2x128xf32>
    %151 = arith.mulf %150, %143 : vector<2x128xf32>
    %cst_72 = arith.constant 0.142857149 : f32
    %152 = vector.broadcast %cst_72 : f32 to vector<2x128xf32>
    %153 = arith.subf %151, %152 : vector<2x128xf32>
    %154 = arith.mulf %153, %143 : vector<2x128xf32>
    %cst_73 = arith.constant 2.000000e-01 : f32
    %155 = vector.broadcast %cst_73 : f32 to vector<2x128xf32>
    %156 = arith.addf %154, %155 : vector<2x128xf32>
    %157 = arith.mulf %156, %143 : vector<2x128xf32>
    %cst_74 = arith.constant 0.333333343 : f32
    %158 = vector.broadcast %cst_74 : f32 to vector<2x128xf32>
    %159 = arith.subf %157, %158 : vector<2x128xf32>
    %160 = arith.mulf %159, %143 : vector<2x128xf32>
    %cst_75 = arith.constant 1.000000e+00 : f32
    %161 = vector.broadcast %cst_75 : f32 to vector<2x128xf32>
    %162 = arith.addf %160, %161 : vector<2x128xf32>
    %163 = arith.mulf %142, %162 : vector<2x128xf32>
    %cst_76 = arith.constant 4.000000e+00 : f32
    %164 = vector.broadcast %cst_76 : f32 to vector<2x128xf32>
    %165 = arith.mulf %164, %163 : vector<2x128xf32>
    %cst_77 = arith.constant -0.890399992 : f32
    %166 = vector.broadcast %cst_77 : f32 to vector<2x128xf32>
    %167 = arith.mulf %166, %165 : vector<2x128xf32>
    %168 = math.exp %167 : vector<2x128xf32>
    %169 = arith.mulf %114, %168 : vector<2x128xf32>
    %170 = vector.extract_strided_slice %7 {offsets = [64, 0], sizes = [32, 128], strides = [1, 1]} : vector<192x128xf32> to vector<32x128xf32>
    %171 = vector.extract_strided_slice %7 {offsets = [96, 0], sizes = [32, 128], strides = [1, 1]} : vector<192x128xf32> to vector<32x128xf32>
    %c1 = arith.constant 1 : index
    %c0_78 = arith.constant 0 : index
    %c0_79 = arith.constant 0 : index
    %172 = vector.load %arg5[%c1, %c0_78, %c0_79] : memref<3x32x2xf32, #tpu.memory_space<vmem>>, vector<1x32x2xf32>
    %173 = vector.shape_cast %172 : vector<1x32x2xf32> to vector<32x2xf32>
    %cst_80 = arith.constant dense<0.000000e+00> : vector<32x128xf32>
    %174 = tpu.matmul %173, %169, %cst_80 {dimension_numbers = #tpu.dot_dimension_numbers<[1], [0], [0], [1], [0, 0, 1, 1], [], []>} : vector<32x2xf32>, vector<2x128xf32>, vector<32x128xf32> -> vector<32x128xf32>
    %175 = arith.addf %174, %170 : vector<32x128xf32>
    %cst_81 = arith.constant 0.000000e+00 : f32
    %176 = vector.broadcast %cst_81 : f32 to vector<32x128xf32>
    %177 = arith.maximumf %175, %176 : vector<32x128xf32>
    %c2_82 = arith.constant 2 : index
    %c0_83 = arith.constant 0 : index
    %c0_84 = arith.constant 0 : index
    %178 = vector.load %arg7[%c2_82, %c0_83, %c0_84] : memref<6x32x32xf32, #tpu.memory_space<vmem>>, vector<1x32x32xf32>
    %179 = vector.shape_cast %178 : vector<1x32x32xf32> to vector<32x32xf32>
    %cst_85 = arith.constant dense<0.000000e+00> : vector<32x128xf32>
    %180 = tpu.matmul %179, %177, %cst_85 {dimension_numbers = #tpu.dot_dimension_numbers<[1], [0], [0], [1], [0, 0, 1, 1], [], []>} : vector<32x32xf32>, vector<32x128xf32>, vector<32x128xf32> -> vector<32x128xf32>
    %c2_86 = arith.constant 2 : index
    %c0_87 = arith.constant 0 : index
    %c0_88 = arith.constant 0 : index
    %181 = vector.load %arg8[%c2_86, %c0_87, %c0_88] : memref<6x32x1xf32, #tpu.memory_space<vmem>>, vector<1x32x1xf32>
    %182 = vector.shape_cast %181 : vector<1x32x1xf32> to vector<32x1xf32>
    %183 = vector.broadcast %182 : vector<32x1xf32> to vector<32x128xf32>
    %184 = arith.addf %180, %183 : vector<32x128xf32>
    %cst_89 = arith.constant 0.000000e+00 : f32
    %185 = vector.broadcast %cst_89 : f32 to vector<32x128xf32>
    %186 = arith.maximumf %184, %185 : vector<32x128xf32>
    %c1_90 = arith.constant 1 : index
    %c0_91 = arith.constant 0 : index
    %c0_92 = arith.constant 0 : index
    %187 = vector.load %arg9[%c1_90, %c0_91, %c0_92] : memref<3x6x32xf32, #tpu.memory_space<vmem>>, vector<1x6x32xf32>
    %188 = vector.shape_cast %187 : vector<1x6x32xf32> to vector<6x32xf32>
    %cst_93 = arith.constant dense<0.000000e+00> : vector<6x128xf32>
    %189 = tpu.matmul %188, %186, %cst_93 {dimension_numbers = #tpu.dot_dimension_numbers<[1], [0], [0], [1], [0, 0, 1, 1], [], []>} : vector<6x32xf32>, vector<32x128xf32>, vector<6x128xf32> -> vector<6x128xf32>
    %c1_94 = arith.constant 1 : index
    %c0_95 = arith.constant 0 : index
    %c0_96 = arith.constant 0 : index
    %190 = vector.load %arg10[%c1_94, %c0_95, %c0_96] : memref<3x6x1xf32, #tpu.memory_space<vmem>>, vector<1x6x1xf32>
    %191 = vector.shape_cast %190 : vector<1x6x1xf32> to vector<6x1xf32>
    %192 = vector.broadcast %191 : vector<6x1xf32> to vector<6x128xf32>
    %193 = arith.addf %189, %192 : vector<6x128xf32>
    %194 = vector.extract_strided_slice %193 {offsets = [0, 0], sizes = [3, 128], strides = [1, 1]} : vector<6x128xf32> to vector<3x128xf32>
    %195 = vector.extract_strided_slice %193 {offsets = [3, 0], sizes = [3, 128], strides = [1, 1]} : vector<6x128xf32> to vector<3x128xf32>
    %196 = arith.subf %89, %195 : vector<3x128xf32>
    %cst_97 = arith.constant 0.714285731 : f32
    %197 = vector.broadcast %cst_97 : f32 to vector<3x128xf32>
    %198 = arith.mulf %194, %197 : vector<3x128xf32>
    %199 = arith.mulf %198, %198 : vector<3x128xf32>
    %cst_98 = arith.constant 1.000000e+00 : f32
    %200 = vector.broadcast %cst_98 : f32 to vector<3x128xf32>
    %201 = arith.addf %200, %199 : vector<3x128xf32>
    %202 = math.rsqrt %201 : vector<3x128xf32>
    %cst_99 = arith.constant 1.000000e+00 : f32
    %203 = vector.broadcast %cst_99 : f32 to vector<3x128xf32>
    %204 = arith.addf %203, %202 : vector<3x128xf32>
    %205 = tpu.reciprocal %204 {approx = true} : vector<3x128xf32> -> vector<3x128xf32>
    %206 = arith.mulf %204, %205 : vector<3x128xf32>
    %cst_100 = arith.constant 2.000000e+00 : f32
    %207 = vector.broadcast %cst_100 : f32 to vector<3x128xf32>
    %208 = arith.subf %207, %206 : vector<3x128xf32>
    %209 = arith.mulf %205, %208 : vector<3x128xf32>
    %210 = arith.mulf %198, %202 : vector<3x128xf32>
    %211 = arith.mulf %210, %209 : vector<3x128xf32>
    %212 = arith.mulf %211, %211 : vector<3x128xf32>
    %cst_101 = arith.constant 1.000000e+00 : f32
    %213 = vector.broadcast %cst_101 : f32 to vector<3x128xf32>
    %214 = arith.addf %213, %212 : vector<3x128xf32>
    %215 = math.rsqrt %214 : vector<3x128xf32>
    %cst_102 = arith.constant 1.000000e+00 : f32
    %216 = vector.broadcast %cst_102 : f32 to vector<3x128xf32>
    %217 = arith.addf %216, %215 : vector<3x128xf32>
    %218 = tpu.reciprocal %217 {approx = true} : vector<3x128xf32> -> vector<3x128xf32>
    %219 = arith.mulf %217, %218 : vector<3x128xf32>
    %cst_103 = arith.constant 2.000000e+00 : f32
    %220 = vector.broadcast %cst_103 : f32 to vector<3x128xf32>
    %221 = arith.subf %220, %219 : vector<3x128xf32>
    %222 = arith.mulf %218, %221 : vector<3x128xf32>
    %223 = arith.mulf %211, %215 : vector<3x128xf32>
    %224 = arith.mulf %223, %222 : vector<3x128xf32>
    %225 = arith.mulf %224, %224 : vector<3x128xf32>
    %cst_104 = arith.constant 0.0769230798 : f32
    %226 = vector.broadcast %cst_104 : f32 to vector<3x128xf32>
    %227 = arith.mulf %226, %225 : vector<3x128xf32>
    %cst_105 = arith.constant 0.0909090936 : f32
    %228 = vector.broadcast %cst_105 : f32 to vector<3x128xf32>
    %229 = arith.subf %227, %228 : vector<3x128xf32>
    %230 = arith.mulf %229, %225 : vector<3x128xf32>
    %cst_106 = arith.constant 0.111111112 : f32
    %231 = vector.broadcast %cst_106 : f32 to vector<3x128xf32>
    %232 = arith.addf %230, %231 : vector<3x128xf32>
    %233 = arith.mulf %232, %225 : vector<3x128xf32>
    %cst_107 = arith.constant 0.142857149 : f32
    %234 = vector.broadcast %cst_107 : f32 to vector<3x128xf32>
    %235 = arith.subf %233, %234 : vector<3x128xf32>
    %236 = arith.mulf %235, %225 : vector<3x128xf32>
    %cst_108 = arith.constant 2.000000e-01 : f32
    %237 = vector.broadcast %cst_108 : f32 to vector<3x128xf32>
    %238 = arith.addf %236, %237 : vector<3x128xf32>
    %239 = arith.mulf %238, %225 : vector<3x128xf32>
    %cst_109 = arith.constant 0.333333343 : f32
    %240 = vector.broadcast %cst_109 : f32 to vector<3x128xf32>
    %241 = arith.subf %239, %240 : vector<3x128xf32>
    %242 = arith.mulf %241, %225 : vector<3x128xf32>
    %cst_110 = arith.constant 1.000000e+00 : f32
    %243 = vector.broadcast %cst_110 : f32 to vector<3x128xf32>
    %244 = arith.addf %242, %243 : vector<3x128xf32>
    %245 = arith.mulf %224, %244 : vector<3x128xf32>
    %cst_111 = arith.constant 4.000000e+00 : f32
    %246 = vector.broadcast %cst_111 : f32 to vector<3x128xf32>
    %247 = arith.mulf %246, %245 : vector<3x128xf32>
    %cst_112 = arith.constant -0.890399992 : f32
    %248 = vector.broadcast %cst_112 : f32 to vector<3x128xf32>
    %249 = arith.mulf %248, %247 : vector<3x128xf32>
    %250 = math.exp %249 : vector<3x128xf32>
    %251 = arith.mulf %196, %250 : vector<3x128xf32>
    %c1_113 = arith.constant 1 : index
    %c0_114 = arith.constant 0 : index
    %c0_115 = arith.constant 0 : index
    %252 = vector.load %arg6[%c1_113, %c0_114, %c0_115] : memref<3x32x3xf32, #tpu.memory_space<vmem>>, vector<1x32x3xf32>
    %253 = vector.shape_cast %252 : vector<1x32x3xf32> to vector<32x3xf32>
    %cst_116 = arith.constant dense<0.000000e+00> : vector<32x128xf32>
    %254 = tpu.matmul %253, %251, %cst_116 {dimension_numbers = #tpu.dot_dimension_numbers<[1], [0], [0], [1], [0, 0, 1, 1], [], []>} : vector<32x3xf32>, vector<3x128xf32>, vector<32x128xf32> -> vector<32x128xf32>
    %255 = arith.addf %254, %171 : vector<32x128xf32>
    %cst_117 = arith.constant 0.000000e+00 : f32
    %256 = vector.broadcast %cst_117 : f32 to vector<32x128xf32>
    %257 = arith.maximumf %255, %256 : vector<32x128xf32>
    %c3 = arith.constant 3 : index
    %c0_118 = arith.constant 0 : index
    %c0_119 = arith.constant 0 : index
    %258 = vector.load %arg7[%c3, %c0_118, %c0_119] : memref<6x32x32xf32, #tpu.memory_space<vmem>>, vector<1x32x32xf32>
    %259 = vector.shape_cast %258 : vector<1x32x32xf32> to vector<32x32xf32>
    %cst_120 = arith.constant dense<0.000000e+00> : vector<32x128xf32>
    %260 = tpu.matmul %259, %257, %cst_120 {dimension_numbers = #tpu.dot_dimension_numbers<[1], [0], [0], [1], [0, 0, 1, 1], [], []>} : vector<32x32xf32>, vector<32x128xf32>, vector<32x128xf32> -> vector<32x128xf32>
    %c3_121 = arith.constant 3 : index
    %c0_122 = arith.constant 0 : index
    %c0_123 = arith.constant 0 : index
    %261 = vector.load %arg8[%c3_121, %c0_122, %c0_123] : memref<6x32x1xf32, #tpu.memory_space<vmem>>, vector<1x32x1xf32>
    %262 = vector.shape_cast %261 : vector<1x32x1xf32> to vector<32x1xf32>
    %263 = vector.broadcast %262 : vector<32x1xf32> to vector<32x128xf32>
    %264 = arith.addf %260, %263 : vector<32x128xf32>
    %cst_124 = arith.constant 0.000000e+00 : f32
    %265 = vector.broadcast %cst_124 : f32 to vector<32x128xf32>
    %266 = arith.maximumf %264, %265 : vector<32x128xf32>
    %c1_125 = arith.constant 1 : index
    %c0_126 = arith.constant 0 : index
    %c0_127 = arith.constant 0 : index
    %267 = vector.load %arg11[%c1_125, %c0_126, %c0_127] : memref<3x4x32xf32, #tpu.memory_space<vmem>>, vector<1x4x32xf32>
    %268 = vector.shape_cast %267 : vector<1x4x32xf32> to vector<4x32xf32>
    %cst_128 = arith.constant dense<0.000000e+00> : vector<4x128xf32>
    %269 = tpu.matmul %268, %266, %cst_128 {dimension_numbers = #tpu.dot_dimension_numbers<[1], [0], [0], [1], [0, 0, 1, 1], [], []>} : vector<4x32xf32>, vector<32x128xf32>, vector<4x128xf32> -> vector<4x128xf32>
    %c1_129 = arith.constant 1 : index
    %c0_130 = arith.constant 0 : index
    %c0_131 = arith.constant 0 : index
    %270 = vector.load %arg12[%c1_129, %c0_130, %c0_131] : memref<3x4x1xf32, #tpu.memory_space<vmem>>, vector<1x4x1xf32>
    %271 = vector.shape_cast %270 : vector<1x4x1xf32> to vector<4x1xf32>
    %272 = vector.broadcast %271 : vector<4x1xf32> to vector<4x128xf32>
    %273 = arith.addf %269, %272 : vector<4x128xf32>
    %274 = vector.extract_strided_slice %273 {offsets = [0, 0], sizes = [2, 128], strides = [1, 1]} : vector<4x128xf32> to vector<2x128xf32>
    %275 = vector.extract_strided_slice %273 {offsets = [2, 0], sizes = [2, 128], strides = [1, 1]} : vector<4x128xf32> to vector<2x128xf32>
    %276 = arith.subf %169, %275 : vector<2x128xf32>
    %cst_132 = arith.constant 0.714285731 : f32
    %277 = vector.broadcast %cst_132 : f32 to vector<2x128xf32>
    %278 = arith.mulf %274, %277 : vector<2x128xf32>
    %279 = arith.mulf %278, %278 : vector<2x128xf32>
    %cst_133 = arith.constant 1.000000e+00 : f32
    %280 = vector.broadcast %cst_133 : f32 to vector<2x128xf32>
    %281 = arith.addf %280, %279 : vector<2x128xf32>
    %282 = math.rsqrt %281 : vector<2x128xf32>
    %cst_134 = arith.constant 1.000000e+00 : f32
    %283 = vector.broadcast %cst_134 : f32 to vector<2x128xf32>
    %284 = arith.addf %283, %282 : vector<2x128xf32>
    %285 = tpu.reciprocal %284 {approx = true} : vector<2x128xf32> -> vector<2x128xf32>
    %286 = arith.mulf %284, %285 : vector<2x128xf32>
    %cst_135 = arith.constant 2.000000e+00 : f32
    %287 = vector.broadcast %cst_135 : f32 to vector<2x128xf32>
    %288 = arith.subf %287, %286 : vector<2x128xf32>
    %289 = arith.mulf %285, %288 : vector<2x128xf32>
    %290 = arith.mulf %278, %282 : vector<2x128xf32>
    %291 = arith.mulf %290, %289 : vector<2x128xf32>
    %292 = arith.mulf %291, %291 : vector<2x128xf32>
    %cst_136 = arith.constant 1.000000e+00 : f32
    %293 = vector.broadcast %cst_136 : f32 to vector<2x128xf32>
    %294 = arith.addf %293, %292 : vector<2x128xf32>
    %295 = math.rsqrt %294 : vector<2x128xf32>
    %cst_137 = arith.constant 1.000000e+00 : f32
    %296 = vector.broadcast %cst_137 : f32 to vector<2x128xf32>
    %297 = arith.addf %296, %295 : vector<2x128xf32>
    %298 = tpu.reciprocal %297 {approx = true} : vector<2x128xf32> -> vector<2x128xf32>
    %299 = arith.mulf %297, %298 : vector<2x128xf32>
    %cst_138 = arith.constant 2.000000e+00 : f32
    %300 = vector.broadcast %cst_138 : f32 to vector<2x128xf32>
    %301 = arith.subf %300, %299 : vector<2x128xf32>
    %302 = arith.mulf %298, %301 : vector<2x128xf32>
    %303 = arith.mulf %291, %295 : vector<2x128xf32>
    %304 = arith.mulf %303, %302 : vector<2x128xf32>
    %305 = arith.mulf %304, %304 : vector<2x128xf32>
    %cst_139 = arith.constant 0.0769230798 : f32
    %306 = vector.broadcast %cst_139 : f32 to vector<2x128xf32>
    %307 = arith.mulf %306, %305 : vector<2x128xf32>
    %cst_140 = arith.constant 0.0909090936 : f32
    %308 = vector.broadcast %cst_140 : f32 to vector<2x128xf32>
    %309 = arith.subf %307, %308 : vector<2x128xf32>
    %310 = arith.mulf %309, %305 : vector<2x128xf32>
    %cst_141 = arith.constant 0.111111112 : f32
    %311 = vector.broadcast %cst_141 : f32 to vector<2x128xf32>
    %312 = arith.addf %310, %311 : vector<2x128xf32>
    %313 = arith.mulf %312, %305 : vector<2x128xf32>
    %cst_142 = arith.constant 0.142857149 : f32
    %314 = vector.broadcast %cst_142 : f32 to vector<2x128xf32>
    %315 = arith.subf %313, %314 : vector<2x128xf32>
    %316 = arith.mulf %315, %305 : vector<2x128xf32>
    %cst_143 = arith.constant 2.000000e-01 : f32
    %317 = vector.broadcast %cst_143 : f32 to vector<2x128xf32>
    %318 = arith.addf %316, %317 : vector<2x128xf32>
    %319 = arith.mulf %318, %305 : vector<2x128xf32>
    %cst_144 = arith.constant 0.333333343 : f32
    %320 = vector.broadcast %cst_144 : f32 to vector<2x128xf32>
    %321 = arith.subf %319, %320 : vector<2x128xf32>
    %322 = arith.mulf %321, %305 : vector<2x128xf32>
    %cst_145 = arith.constant 1.000000e+00 : f32
    %323 = vector.broadcast %cst_145 : f32 to vector<2x128xf32>
    %324 = arith.addf %322, %323 : vector<2x128xf32>
    %325 = arith.mulf %304, %324 : vector<2x128xf32>
    %cst_146 = arith.constant 4.000000e+00 : f32
    %326 = vector.broadcast %cst_146 : f32 to vector<2x128xf32>
    %327 = arith.mulf %326, %325 : vector<2x128xf32>
    %cst_147 = arith.constant -0.890399992 : f32
    %328 = vector.broadcast %cst_147 : f32 to vector<2x128xf32>
    %329 = arith.mulf %328, %327 : vector<2x128xf32>
    %330 = math.exp %329 : vector<2x128xf32>
    %331 = arith.mulf %276, %330 : vector<2x128xf32>
    %332 = vector.extract_strided_slice %7 {offsets = [0, 0], sizes = [32, 128], strides = [1, 1]} : vector<192x128xf32> to vector<32x128xf32>
    %333 = vector.extract_strided_slice %7 {offsets = [32, 0], sizes = [32, 128], strides = [1, 1]} : vector<192x128xf32> to vector<32x128xf32>
    %c0_148 = arith.constant 0 : index
    %c0_149 = arith.constant 0 : index
    %c0_150 = arith.constant 0 : index
    %334 = vector.load %arg5[%c0_148, %c0_149, %c0_150] : memref<3x32x2xf32, #tpu.memory_space<vmem>>, vector<1x32x2xf32>
    %335 = vector.shape_cast %334 : vector<1x32x2xf32> to vector<32x2xf32>
    %cst_151 = arith.constant dense<0.000000e+00> : vector<32x128xf32>
    %336 = tpu.matmul %335, %331, %cst_151 {dimension_numbers = #tpu.dot_dimension_numbers<[1], [0], [0], [1], [0, 0, 1, 1], [], []>} : vector<32x2xf32>, vector<2x128xf32>, vector<32x128xf32> -> vector<32x128xf32>
    %337 = arith.addf %336, %332 : vector<32x128xf32>
    %cst_152 = arith.constant 0.000000e+00 : f32
    %338 = vector.broadcast %cst_152 : f32 to vector<32x128xf32>
    %339 = arith.maximumf %337, %338 : vector<32x128xf32>
    %c0_153 = arith.constant 0 : index
    %c0_154 = arith.constant 0 : index
    %c0_155 = arith.constant 0 : index
    %340 = vector.load %arg7[%c0_153, %c0_154, %c0_155] : memref<6x32x32xf32, #tpu.memory_space<vmem>>, vector<1x32x32xf32>
    %341 = vector.shape_cast %340 : vector<1x32x32xf32> to vector<32x32xf32>
    %cst_156 = arith.constant dense<0.000000e+00> : vector<32x128xf32>
    %342 = tpu.matmul %341, %339, %cst_156 {dimension_numbers = #tpu.dot_dimension_numbers<[1], [0], [0], [1], [0, 0, 1, 1], [], []>} : vector<32x32xf32>, vector<32x128xf32>, vector<32x128xf32> -> vector<32x128xf32>
    %c0_157 = arith.constant 0 : index
    %c0_158 = arith.constant 0 : index
    %c0_159 = arith.constant 0 : index
    %343 = vector.load %arg8[%c0_157, %c0_158, %c0_159] : memref<6x32x1xf32, #tpu.memory_space<vmem>>, vector<1x32x1xf32>
    %344 = vector.shape_cast %343 : vector<1x32x1xf32> to vector<32x1xf32>
    %345 = vector.broadcast %344 : vector<32x1xf32> to vector<32x128xf32>
    %346 = arith.addf %342, %345 : vector<32x128xf32>
    %cst_160 = arith.constant 0.000000e+00 : f32
    %347 = vector.broadcast %cst_160 : f32 to vector<32x128xf32>
    %348 = arith.maximumf %346, %347 : vector<32x128xf32>
    %c0_161 = arith.constant 0 : index
    %c0_162 = arith.constant 0 : index
    %c0_163 = arith.constant 0 : index
    %349 = vector.load %arg9[%c0_161, %c0_162, %c0_163] : memref<3x6x32xf32, #tpu.memory_space<vmem>>, vector<1x6x32xf32>
    %350 = vector.shape_cast %349 : vector<1x6x32xf32> to vector<6x32xf32>
    %cst_164 = arith.constant dense<0.000000e+00> : vector<6x128xf32>
    %351 = tpu.matmul %350, %348, %cst_164 {dimension_numbers = #tpu.dot_dimension_numbers<[1], [0], [0], [1], [0, 0, 1, 1], [], []>} : vector<6x32xf32>, vector<32x128xf32>, vector<6x128xf32> -> vector<6x128xf32>
    %c0_165 = arith.constant 0 : index
    %c0_166 = arith.constant 0 : index
    %c0_167 = arith.constant 0 : index
    %352 = vector.load %arg10[%c0_165, %c0_166, %c0_167] : memref<3x6x1xf32, #tpu.memory_space<vmem>>, vector<1x6x1xf32>
    %353 = vector.shape_cast %352 : vector<1x6x1xf32> to vector<6x1xf32>
    %354 = vector.broadcast %353 : vector<6x1xf32> to vector<6x128xf32>
    %355 = arith.addf %351, %354 : vector<6x128xf32>
    %356 = vector.extract_strided_slice %355 {offsets = [0, 0], sizes = [3, 128], strides = [1, 1]} : vector<6x128xf32> to vector<3x128xf32>
    %357 = vector.extract_strided_slice %355 {offsets = [3, 0], sizes = [3, 128], strides = [1, 1]} : vector<6x128xf32> to vector<3x128xf32>
    %358 = arith.subf %251, %357 : vector<3x128xf32>
    %cst_168 = arith.constant 0.714285731 : f32
    %359 = vector.broadcast %cst_168 : f32 to vector<3x128xf32>
    %360 = arith.mulf %356, %359 : vector<3x128xf32>
    %361 = arith.mulf %360, %360 : vector<3x128xf32>
    %cst_169 = arith.constant 1.000000e+00 : f32
    %362 = vector.broadcast %cst_169 : f32 to vector<3x128xf32>
    %363 = arith.addf %362, %361 : vector<3x128xf32>
    %364 = math.rsqrt %363 : vector<3x128xf32>
    %cst_170 = arith.constant 1.000000e+00 : f32
    %365 = vector.broadcast %cst_170 : f32 to vector<3x128xf32>
    %366 = arith.addf %365, %364 : vector<3x128xf32>
    %367 = tpu.reciprocal %366 {approx = true} : vector<3x128xf32> -> vector<3x128xf32>
    %368 = arith.mulf %366, %367 : vector<3x128xf32>
    %cst_171 = arith.constant 2.000000e+00 : f32
    %369 = vector.broadcast %cst_171 : f32 to vector<3x128xf32>
    %370 = arith.subf %369, %368 : vector<3x128xf32>
    %371 = arith.mulf %367, %370 : vector<3x128xf32>
    %372 = arith.mulf %360, %364 : vector<3x128xf32>
    %373 = arith.mulf %372, %371 : vector<3x128xf32>
    %374 = arith.mulf %373, %373 : vector<3x128xf32>
    %cst_172 = arith.constant 1.000000e+00 : f32
    %375 = vector.broadcast %cst_172 : f32 to vector<3x128xf32>
    %376 = arith.addf %375, %374 : vector<3x128xf32>
    %377 = math.rsqrt %376 : vector<3x128xf32>
    %cst_173 = arith.constant 1.000000e+00 : f32
    %378 = vector.broadcast %cst_173 : f32 to vector<3x128xf32>
    %379 = arith.addf %378, %377 : vector<3x128xf32>
    %380 = tpu.reciprocal %379 {approx = true} : vector<3x128xf32> -> vector<3x128xf32>
    %381 = arith.mulf %379, %380 : vector<3x128xf32>
    %cst_174 = arith.constant 2.000000e+00 : f32
    %382 = vector.broadcast %cst_174 : f32 to vector<3x128xf32>
    %383 = arith.subf %382, %381 : vector<3x128xf32>
    %384 = arith.mulf %380, %383 : vector<3x128xf32>
    %385 = arith.mulf %373, %377 : vector<3x128xf32>
    %386 = arith.mulf %385, %384 : vector<3x128xf32>
    %387 = arith.mulf %386, %386 : vector<3x128xf32>
    %cst_175 = arith.constant 0.0769230798 : f32
    %388 = vector.broadcast %cst_175 : f32 to vector<3x128xf32>
    %389 = arith.mulf %388, %387 : vector<3x128xf32>
    %cst_176 = arith.constant 0.0909090936 : f32
    %390 = vector.broadcast %cst_176 : f32 to vector<3x128xf32>
    %391 = arith.subf %389, %390 : vector<3x128xf32>
    %392 = arith.mulf %391, %387 : vector<3x128xf32>
    %cst_177 = arith.constant 0.111111112 : f32
    %393 = vector.broadcast %cst_177 : f32 to vector<3x128xf32>
    %394 = arith.addf %392, %393 : vector<3x128xf32>
    %395 = arith.mulf %394, %387 : vector<3x128xf32>
    %cst_178 = arith.constant 0.142857149 : f32
    %396 = vector.broadcast %cst_178 : f32 to vector<3x128xf32>
    %397 = arith.subf %395, %396 : vector<3x128xf32>
    %398 = arith.mulf %397, %387 : vector<3x128xf32>
    %cst_179 = arith.constant 2.000000e-01 : f32
    %399 = vector.broadcast %cst_179 : f32 to vector<3x128xf32>
    %400 = arith.addf %398, %399 : vector<3x128xf32>
    %401 = arith.mulf %400, %387 : vector<3x128xf32>
    %cst_180 = arith.constant 0.333333343 : f32
    %402 = vector.broadcast %cst_180 : f32 to vector<3x128xf32>
    %403 = arith.subf %401, %402 : vector<3x128xf32>
    %404 = arith.mulf %403, %387 : vector<3x128xf32>
    %cst_181 = arith.constant 1.000000e+00 : f32
    %405 = vector.broadcast %cst_181 : f32 to vector<3x128xf32>
    %406 = arith.addf %404, %405 : vector<3x128xf32>
    %407 = arith.mulf %386, %406 : vector<3x128xf32>
    %cst_182 = arith.constant 4.000000e+00 : f32
    %408 = vector.broadcast %cst_182 : f32 to vector<3x128xf32>
    %409 = arith.mulf %408, %407 : vector<3x128xf32>
    %cst_183 = arith.constant -0.890399992 : f32
    %410 = vector.broadcast %cst_183 : f32 to vector<3x128xf32>
    %411 = arith.mulf %410, %409 : vector<3x128xf32>
    %412 = math.exp %411 : vector<3x128xf32>
    %413 = arith.mulf %358, %412 : vector<3x128xf32>
    %c0_184 = arith.constant 0 : index
    %c0_185 = arith.constant 0 : index
    %c0_186 = arith.constant 0 : index
    %414 = vector.load %arg6[%c0_184, %c0_185, %c0_186] : memref<3x32x3xf32, #tpu.memory_space<vmem>>, vector<1x32x3xf32>
    %415 = vector.shape_cast %414 : vector<1x32x3xf32> to vector<32x3xf32>
    %cst_187 = arith.constant dense<0.000000e+00> : vector<32x128xf32>
    %416 = tpu.matmul %415, %413, %cst_187 {dimension_numbers = #tpu.dot_dimension_numbers<[1], [0], [0], [1], [0, 0, 1, 1], [], []>} : vector<32x3xf32>, vector<3x128xf32>, vector<32x128xf32> -> vector<32x128xf32>
    %417 = arith.addf %416, %333 : vector<32x128xf32>
    %cst_188 = arith.constant 0.000000e+00 : f32
    %418 = vector.broadcast %cst_188 : f32 to vector<32x128xf32>
    %419 = arith.maximumf %417, %418 : vector<32x128xf32>
    %c1_189 = arith.constant 1 : index
    %c0_190 = arith.constant 0 : index
    %c0_191 = arith.constant 0 : index
    %420 = vector.load %arg7[%c1_189, %c0_190, %c0_191] : memref<6x32x32xf32, #tpu.memory_space<vmem>>, vector<1x32x32xf32>
    %421 = vector.shape_cast %420 : vector<1x32x32xf32> to vector<32x32xf32>
    %cst_192 = arith.constant dense<0.000000e+00> : vector<32x128xf32>
    %422 = tpu.matmul %421, %419, %cst_192 {dimension_numbers = #tpu.dot_dimension_numbers<[1], [0], [0], [1], [0, 0, 1, 1], [], []>} : vector<32x32xf32>, vector<32x128xf32>, vector<32x128xf32> -> vector<32x128xf32>
    %c1_193 = arith.constant 1 : index
    %c0_194 = arith.constant 0 : index
    %c0_195 = arith.constant 0 : index
    %423 = vector.load %arg8[%c1_193, %c0_194, %c0_195] : memref<6x32x1xf32, #tpu.memory_space<vmem>>, vector<1x32x1xf32>
    %424 = vector.shape_cast %423 : vector<1x32x1xf32> to vector<32x1xf32>
    %425 = vector.broadcast %424 : vector<32x1xf32> to vector<32x128xf32>
    %426 = arith.addf %422, %425 : vector<32x128xf32>
    %cst_196 = arith.constant 0.000000e+00 : f32
    %427 = vector.broadcast %cst_196 : f32 to vector<32x128xf32>
    %428 = arith.maximumf %426, %427 : vector<32x128xf32>
    %c0_197 = arith.constant 0 : index
    %c0_198 = arith.constant 0 : index
    %c0_199 = arith.constant 0 : index
    %429 = vector.load %arg11[%c0_197, %c0_198, %c0_199] : memref<3x4x32xf32, #tpu.memory_space<vmem>>, vector<1x4x32xf32>
    %430 = vector.shape_cast %429 : vector<1x4x32xf32> to vector<4x32xf32>
    %cst_200 = arith.constant dense<0.000000e+00> : vector<4x128xf32>
    %431 = tpu.matmul %430, %428, %cst_200 {dimension_numbers = #tpu.dot_dimension_numbers<[1], [0], [0], [1], [0, 0, 1, 1], [], []>} : vector<4x32xf32>, vector<32x128xf32>, vector<4x128xf32> -> vector<4x128xf32>
    %c0_201 = arith.constant 0 : index
    %c0_202 = arith.constant 0 : index
    %c0_203 = arith.constant 0 : index
    %432 = vector.load %arg12[%c0_201, %c0_202, %c0_203] : memref<3x4x1xf32, #tpu.memory_space<vmem>>, vector<1x4x1xf32>
    %433 = vector.shape_cast %432 : vector<1x4x1xf32> to vector<4x1xf32>
    %434 = vector.broadcast %433 : vector<4x1xf32> to vector<4x128xf32>
    %435 = arith.addf %431, %434 : vector<4x128xf32>
    %436 = vector.extract_strided_slice %435 {offsets = [0, 0], sizes = [2, 128], strides = [1, 1]} : vector<4x128xf32> to vector<2x128xf32>
    %437 = vector.extract_strided_slice %435 {offsets = [2, 0], sizes = [2, 128], strides = [1, 1]} : vector<4x128xf32> to vector<2x128xf32>
    %438 = arith.subf %331, %437 : vector<2x128xf32>
    %cst_204 = arith.constant 0.714285731 : f32
    %439 = vector.broadcast %cst_204 : f32 to vector<2x128xf32>
    %440 = arith.mulf %436, %439 : vector<2x128xf32>
    %441 = arith.mulf %440, %440 : vector<2x128xf32>
    %cst_205 = arith.constant 1.000000e+00 : f32
    %442 = vector.broadcast %cst_205 : f32 to vector<2x128xf32>
    %443 = arith.addf %442, %441 : vector<2x128xf32>
    %444 = math.rsqrt %443 : vector<2x128xf32>
    %cst_206 = arith.constant 1.000000e+00 : f32
    %445 = vector.broadcast %cst_206 : f32 to vector<2x128xf32>
    %446 = arith.addf %445, %444 : vector<2x128xf32>
    %447 = tpu.reciprocal %446 {approx = true} : vector<2x128xf32> -> vector<2x128xf32>
    %448 = arith.mulf %446, %447 : vector<2x128xf32>
    %cst_207 = arith.constant 2.000000e+00 : f32
    %449 = vector.broadcast %cst_207 : f32 to vector<2x128xf32>
    %450 = arith.subf %449, %448 : vector<2x128xf32>
    %451 = arith.mulf %447, %450 : vector<2x128xf32>
    %452 = arith.mulf %440, %444 : vector<2x128xf32>
    %453 = arith.mulf %452, %451 : vector<2x128xf32>
    %454 = arith.mulf %453, %453 : vector<2x128xf32>
    %cst_208 = arith.constant 1.000000e+00 : f32
    %455 = vector.broadcast %cst_208 : f32 to vector<2x128xf32>
    %456 = arith.addf %455, %454 : vector<2x128xf32>
    %457 = math.rsqrt %456 : vector<2x128xf32>
    %cst_209 = arith.constant 1.000000e+00 : f32
    %458 = vector.broadcast %cst_209 : f32 to vector<2x128xf32>
    %459 = arith.addf %458, %457 : vector<2x128xf32>
    %460 = tpu.reciprocal %459 {approx = true} : vector<2x128xf32> -> vector<2x128xf32>
    %461 = arith.mulf %459, %460 : vector<2x128xf32>
    %cst_210 = arith.constant 2.000000e+00 : f32
    %462 = vector.broadcast %cst_210 : f32 to vector<2x128xf32>
    %463 = arith.subf %462, %461 : vector<2x128xf32>
    %464 = arith.mulf %460, %463 : vector<2x128xf32>
    %465 = arith.mulf %453, %457 : vector<2x128xf32>
    %466 = arith.mulf %465, %464 : vector<2x128xf32>
    %467 = arith.mulf %466, %466 : vector<2x128xf32>
    %cst_211 = arith.constant 0.0769230798 : f32
    %468 = vector.broadcast %cst_211 : f32 to vector<2x128xf32>
    %469 = arith.mulf %468, %467 : vector<2x128xf32>
    %cst_212 = arith.constant 0.0909090936 : f32
    %470 = vector.broadcast %cst_212 : f32 to vector<2x128xf32>
    %471 = arith.subf %469, %470 : vector<2x128xf32>
    %472 = arith.mulf %471, %467 : vector<2x128xf32>
    %cst_213 = arith.constant 0.111111112 : f32
    %473 = vector.broadcast %cst_213 : f32 to vector<2x128xf32>
    %474 = arith.addf %472, %473 : vector<2x128xf32>
    %475 = arith.mulf %474, %467 : vector<2x128xf32>
    %cst_214 = arith.constant 0.142857149 : f32
    %476 = vector.broadcast %cst_214 : f32 to vector<2x128xf32>
    %477 = arith.subf %475, %476 : vector<2x128xf32>
    %478 = arith.mulf %477, %467 : vector<2x128xf32>
    %cst_215 = arith.constant 2.000000e-01 : f32
    %479 = vector.broadcast %cst_215 : f32 to vector<2x128xf32>
    %480 = arith.addf %478, %479 : vector<2x128xf32>
    %481 = arith.mulf %480, %467 : vector<2x128xf32>
    %cst_216 = arith.constant 0.333333343 : f32
    %482 = vector.broadcast %cst_216 : f32 to vector<2x128xf32>
    %483 = arith.subf %481, %482 : vector<2x128xf32>
    %484 = arith.mulf %483, %467 : vector<2x128xf32>
    %cst_217 = arith.constant 1.000000e+00 : f32
    %485 = vector.broadcast %cst_217 : f32 to vector<2x128xf32>
    %486 = arith.addf %484, %485 : vector<2x128xf32>
    %487 = arith.mulf %466, %486 : vector<2x128xf32>
    %cst_218 = arith.constant 4.000000e+00 : f32
    %488 = vector.broadcast %cst_218 : f32 to vector<2x128xf32>
    %489 = arith.mulf %488, %487 : vector<2x128xf32>
    %cst_219 = arith.constant -0.890399992 : f32
    %490 = vector.broadcast %cst_219 : f32 to vector<2x128xf32>
    %491 = arith.mulf %490, %489 : vector<2x128xf32>
    %492 = math.exp %491 : vector<2x128xf32>
    %493 = arith.mulf %438, %492 : vector<2x128xf32>
    %c0_220 = arith.constant 0 : index
    %c0_221 = arith.constant 0 : index
    %494 = vector.load %arg13[%c0_220, %c0_221] : memref<5x128xf32, #tpu.memory_space<vmem>>, vector<2x128xf32>
    tpu.vector_store %arg13[%c0_220, %c0_221], %493 {strides = array<i32>} : memref<5x128xf32, #tpu.memory_space<vmem>>, vector<2x128xf32>,
    %c2_222 = arith.constant 2 : index
    %c0_223 = arith.constant 0 : index
    %495 = vector.load %arg13[%c2_222, %c0_223] : memref<5x128xf32, #tpu.memory_space<vmem>>, vector<3x128xf32>
    tpu.vector_store %arg13[%c2_222, %c0_223], %413 {strides = array<i32>} : memref<5x128xf32, #tpu.memory_space<vmem>>, vector<3x128xf32>,
    return
  }
  func.func @transform_0(%arg0: i32) -> (i32, i32) {
    %c0_i32 = arith.constant 0 : i32
    %c0_i32_0 = arith.constant 0 : i32
    return %c0_i32, %arg0 : i32, i32
  }
  func.func @transform_1(%arg0: i32) -> (i32, i32) {
    %c0_i32 = arith.constant 0 : i32
    %c0_i32_0 = arith.constant 0 : i32
    return %c0_i32, %arg0 : i32, i32
  }
  func.func @transform_2(%arg0: i32) -> (i32, i32) {
    %c0_i32 = arith.constant 0 : i32
    %c0_i32_0 = arith.constant 0 : i32
    %c0_i32_1 = arith.constant 0 : i32
    return %c0_i32, %c0_i32_0 : i32, i32
  }
  func.func @transform_3(%arg0: i32) -> (i32, i32) {
    %c0_i32 = arith.constant 0 : i32
    %c0_i32_0 = arith.constant 0 : i32
    %c0_i32_1 = arith.constant 0 : i32
    return %c0_i32, %c0_i32_0 : i32, i32
  }
  func.func @transform_4(%arg0: i32) -> (i32, i32, i32) {
    %c0_i32 = arith.constant 0 : i32
    %c0_i32_0 = arith.constant 0 : i32
    %c0_i32_1 = arith.constant 0 : i32
    %c0_i32_2 = arith.constant 0 : i32
    return %c0_i32, %c0_i32_0, %c0_i32_1 : i32, i32, i32
  }
  func.func @transform_5(%arg0: i32) -> (i32, i32, i32) {
    %c0_i32 = arith.constant 0 : i32
    %c0_i32_0 = arith.constant 0 : i32
    %c0_i32_1 = arith.constant 0 : i32
    %c0_i32_2 = arith.constant 0 : i32
    return %c0_i32, %c0_i32_0, %c0_i32_1 : i32, i32, i32
  }
  func.func @transform_6(%arg0: i32) -> (i32, i32, i32) {
    %c0_i32 = arith.constant 0 : i32
    %c0_i32_0 = arith.constant 0 : i32
    %c0_i32_1 = arith.constant 0 : i32
    %c0_i32_2 = arith.constant 0 : i32
    return %c0_i32, %c0_i32_0, %c0_i32_1 : i32, i32, i32
  }
  func.func @transform_7(%arg0: i32) -> (i32, i32, i32) {
    %c0_i32 = arith.constant 0 : i32
    %c0_i32_0 = arith.constant 0 : i32
    %c0_i32_1 = arith.constant 0 : i32
    %c0_i32_2 = arith.constant 0 : i32
    return %c0_i32, %c0_i32_0, %c0_i32_1 : i32, i32, i32
  }
  func.func @transform_8(%arg0: i32) -> (i32, i32, i32) {
    %c0_i32 = arith.constant 0 : i32
    %c0_i32_0 = arith.constant 0 : i32
    %c0_i32_1 = arith.constant 0 : i32
    %c0_i32_2 = arith.constant 0 : i32
    return %c0_i32, %c0_i32_0, %c0_i32_1 : i32, i32, i32
  }
  func.func @transform_9(%arg0: i32) -> (i32, i32, i32) {
    %c0_i32 = arith.constant 0 : i32
    %c0_i32_0 = arith.constant 0 : i32
    %c0_i32_1 = arith.constant 0 : i32
    %c0_i32_2 = arith.constant 0 : i32
    return %c0_i32, %c0_i32_0, %c0_i32_1 : i32, i32, i32
  }
  func.func @transform_10(%arg0: i32) -> (i32, i32, i32) {
    %c0_i32 = arith.constant 0 : i32
    %c0_i32_0 = arith.constant 0 : i32
    %c0_i32_1 = arith.constant 0 : i32
    %c0_i32_2 = arith.constant 0 : i32
    return %c0_i32, %c0_i32_0, %c0_i32_1 : i32, i32, i32
  }
  func.func @transform_11(%arg0: i32) -> (i32, i32, i32) {
    %c0_i32 = arith.constant 0 : i32
    %c0_i32_0 = arith.constant 0 : i32
    %c0_i32_1 = arith.constant 0 : i32
    %c0_i32_2 = arith.constant 0 : i32
    return %c0_i32, %c0_i32_0, %c0_i32_1 : i32, i32, i32
  }
  func.func @transform_12(%arg0: i32) -> (i32, i32) {
    %c0_i32 = arith.constant 0 : i32
    %c0_i32_0 = arith.constant 0 : i32
    return %c0_i32, %arg0 : i32, i32
  }
}

</mosaic_0001>

<bundles_post_ra>
// kernel: tpu_custom_call.1
= control target key start
LH: loop header
LB: loop body
LE: loop exit
PB: predicated region body
PF: predicated region fallthrough
CT: control target
= control target key end

     0   :  { %vm286_vm0 = vcmask 1044480   ;;  %vm213_vm1 = vcmask 39936   ;;  %vm493_vm2 = vcmask 1041408   ;;  %v3443_v5 = vmov 0   ;;  %s4069_s0 = inlined_call_operand.vmem [shape: f32[5,128], index: 0, kind: input, shape index: {}]   ;;  %s4070_s1 = inlined_call_operand.vmem [shape: f32[5,128], index: 1, kind: input, shape index: {}]   ;;  %s4071_s2 = inlined_call_operand.vmem [shape: f32[192,5], index: 2, kind: input, shape index: {}]   ;;  %s4072_s3 = inlined_call_operand.vmem [shape: f32[192,1], index: 3, kind: input, shape index: {}]   ;;  %s4073_s4 = inlined_call_operand.vmem [shape: f32[3,32,2], index: 4, kind: input, shape index: {}]   ;;  %s4074_s5 = inlined_call_operand.vmem [shape: f32[3,32,3], index: 5, kind: input, shape index: {}]   ;;  %s4075_s6 = inlined_call_operand.vmem [shape: f32[6,32,32], index: 6, kind: input, shape index: {}]   ;;  %s4076_s7 = inlined_call_operand.vmem [shape: f32[6,32,1], index: 7, kind: input, shape index: {}]   ;;  %s4077_s8 = inlined_call_operand.vmem [shape: f32[3,6,32], index: 8, kind: input, shape index: {}]   ;;  %s4078_s9 = inlined_call_operand.vmem [shape: f32[3,6,1], index: 9, kind: input, shape index: {}]   ;;  %s4079_s10 = inlined_call_operand.vmem [shape: f32[3,4,32], index: 10, kind: input, shape index: {}]   ;;  %s4080_s11 = inlined_call_operand.vmem [shape: f32[3,4,1], index: 11, kind: input, shape index: {}]   ;;  %s4081_s12 = inlined_call_operand.hbm [shape: f32[5,128], index: 12, kind: output, shape index: {}]  }
   0x1   :  { %v44_v0 = vld [vmem:[%s4070_s1] sm:$0x1f]  ;;  %v46_v2 = vld [vmem:[%s4071_s2 + $0x8] sm:$0xff]  ;;  %v47_v3 = vld [vmem:[%s4071_s2 + $0x10] sm:$0xff]  ;;  %3357 = vset.pattern.permute.xlu0 %v3443_v5  ;;  %3358 = vset.pattern.permute.xlu1 %v3443_v5 }
   0x2   :  { %v45_v1 = vld [vmem:[%s4071_s2] sm:$0xff]  ;;  %2984 = vmatprep.subr.msk.mxu0 %vm286_vm0, %v44_v0  ;;  %v48_v6 = vld [vmem:[%s4071_s2 + $0x18] sm:$0xff]  ;;  %v87_v9 = vld [vmem:[%s4072_s3 + $0x90] sm:$0xff] }
   0x3   :  { %2986 = vmatprep.mubr.msk.f32.mxu0 %vm213_vm1, %v45_v1  ;;  %v3529_v4 = vld [vmem:[%s4069_s0] sm:$0x3]  ;;  %2985 = vmatpush3.msk.msra.mxu0 %vm286_vm0, %v44_v0  ;;  %v86_v10 = vld [vmem:[%s4072_s3 + $0x88] sm:$0xff]  ;;  %v88_v12 = vld [vmem:[%s4072_s3 + $0x98] sm:$0xff] }
   0x4   :  { %2987 = vmatmul.mubr.msk.f32.vlgmr.msra.gmra.mrb[0].mxu0 %vm213_vm1, %v46_v2  ;;  %3022 = vmatprep.subr.msk.mxu0 %vm493_vm2, %v3529_v4  ;;  %v49_v7 = vld [vmem:[%s4071_s2 + $0x20] sm:$0xff]  ;;  %v50_v11 = vld [vmem:[%s4071_s2 + $0x28] sm:$0xff]  ;;  %v51_v13 = vld [vmem:[%s4071_s2 + $0x30] sm:$0xff] }
   0x5   :  { %2989 = vmatprep.mubr.msk.f32.mxu0 %vm213_vm1, %v47_v3  ;;  %3023 = vmatpush3.msk.msra.mxu0 %vm493_vm2, %v3529_v4  ;;  %v85_v8 = vld [vmem:[%s4072_s3 + $0x80] sm:$0xff]  ;;  %v52_v15 = vld [vmem:[%s4071_s2 + $0x38] sm:$0xff]  ;;  %v2723_v16 = vld [vmem:[%s4076_s7 + $0x88] sm:$0xff] }
   0x6   :  { %175 = vperm.xlu0 %3357, %v85_v8   ;;  %185 = vperm.xlu1 %3358, %v87_v9   ;;  %v2722_v14 = vld [vmem:[%s4076_s7 + $0x80] sm:$0xff]  ;;  %v2724_v18 = vld [vmem:[%s4076_s7 + $0x90] sm:$0xff]  ;;  %v54_v19 = vld [vmem:[%s4071_s2 + $0x48] sm:$0xff] }
   0x7   :  { %v53_v17 = vld [vmem:[%s4071_s2 + $0x40] sm:$0xff]  ;;  %v2725_v20 = vld [vmem:[%s4076_s7 + $0x98] sm:$0xff]  ;;  %v55_v21 = vld [vmem:[%s4071_s2 + $0x50] sm:$0xff] }
   0x8   :  { %2990 = vmatmul.mubr.msk.f32.gmra.mrb[2].mxu0 %vm213_vm1, %v48_v6  ;;  %v2731_v22 = vld [vmem:[%s4078_s9 + $0x10] sm:$0x3f]  ;;  %v56_v23 = vld [vmem:[%s4071_s2 + $0x58] sm:$0xff]  ;;  %v89_v24 = vld [vmem:[%s4072_s3 + $0xa0] sm:$0xff] }
   0x9   :  { %2992 = vmatprep.mubr.msk.f32.mxu0 %vm213_vm1, %v49_v7  ;;  %v57_v25 = vld [vmem:[%s4071_s2 + $0x60] sm:$0xff]  ;;  %v90_v26 = vld [vmem:[%s4072_s3 + $0xa8] sm:$0xff]  ;;  %v91_v28 = vld [vmem:[%s4072_s3 + $0xb0] sm:$0xff] }
   0xa   :  { %180 = vperm.xlu0 %3357, %v86_v10   ;;  %190 = vperm.xlu1 %3358, %v88_v12   ;;  %v58_v27 = vld [vmem:[%s4071_s2 + $0x68] sm:$0xff]  ;;  %v59_v29 = vld [vmem:[%s4071_s2 + $0x70] sm:$0xff]  ;;  %v92_v30 = vld [vmem:[%s4072_s3 + $0xb8] sm:$0xff] }
   0xb   :  { %v60_v31 = vld [vmem:[%s4071_s2 + $0x78] sm:$0xff]  ;;  %v2749_v32 = vld [vmem:[%s4076_s7 + $0xa0] sm:$0xff] }
   0xc   :  { %2993 = vmatmul.mubr.msk.f32.gmra.mrb[4].mxu0 %vm213_vm1, %v50_v11 }
   0xd   :  { %2995 = vmatprep.mubr.msk.f32.mxu0 %vm213_vm1, %v51_v13 }
   0xe   :  { %598 = vperm.xlu0 %3357, %v2722_v14   ;;  %603 = vperm.xlu1 %3358, %v2723_v16  }
  0x10   :  { %2996 = vmatmul.mubr.msk.f32.gmra.mrb[6].mxu0 %vm213_vm1, %v52_v15 }
  0x11   :  { %2998 = vmatprep.mubr.msk.f32.mxu0 %vm213_vm1, %v53_v17 }
  0x12   :  { %608 = vperm.xlu0 %3357, %v2724_v18   ;;  %613 = vperm.xlu1 %3358, %v2725_v20  }
  0x14   :  { %2999 = vmatmul.mubr.msk.f32.gmra.mrb[8].mxu0 %vm213_vm1, %v54_v19 }
  0x15   :  { %3001 = vmatprep.mubr.msk.f32.mxu0 %vm213_vm1, %v55_v21 }
  0x16   :  { %724 = vperm.xlu0 %3357, %v2731_v22   ;;  %195 = vperm.xlu1 %3358, %v89_v24  }
  0x18   :  { %3002 = vmatmul.mubr.msk.f32.gmra.mrb[10].mxu0 %vm213_vm1, %v56_v23 }
  0x19   :  { %3004 = vmatprep.mubr.msk.f32.mxu0 %vm213_vm1, %v57_v25 }
  0x1a   :  { %200 = vperm.xlu0 %3357, %v90_v26   ;;  %205 = vperm.xlu1 %3358, %v91_v28  }
  0x1c   :  { %3005 = vmatmul.mubr.msk.f32.gmra.mrb[12].mxu0 %vm213_vm1, %v58_v27 }
  0x1d   :  { %3007 = vmatprep.mubr.msk.f32.mxu0 %vm213_vm1, %v59_v29 }
  0x1e   :  { %17 = vsyncpa [#allocation3], 0  ;;  %v61_v33 = vld [vmem:[%s4071_s2 + $0x80] sm:$0xff]  ;;  %210 = vperm.xlu0 %3357, %v92_v30   ;;  %967 = vperm.xlu1 %3358, %v2749_v32   ;;  %v2750_v34 = vld [vmem:[%s4076_s7 + $0xa8] sm:$0xff]  ;;  %vm480_vm3 = vcmask 15360   ;;  %vm616_vm4 = vcmask 261120  }
  0x1f   :  { %v62_v35 = vld [vmem:[%s4071_s2 + $0x88] sm:$0xff]  ;;  %v2751_v36 = vld [vmem:[%s4076_s7 + $0xb0] sm:$0xff]  ;;  %v2752_v38 = vld [vmem:[%s4076_s7 + $0xb8] sm:$0xff]  ;;  %vm3445_vm5 = vmmov 0   ;;  %vm849_vm6 = vcmask 23552   ;;  %vm862_vm7 = vcmask 1042432  }
  0x20   :  { %3008 = vmatmul.mubr.msk.f32.gmra.mrb[14].mxu0 %vm213_vm1, %v60_v31  ;;  %v63_v37 = vld [vmem:[%s4071_s2 + $0x90] sm:$0xff]  ;;  %v64_v39 = vld [vmem:[%s4071_s2 + $0x98] sm:$0xff]  ;;  %v2758_v40 = vld [vmem:[%s4080_s11 + $0x8] sm:$0xf] }
  0x21   :  { %3010 = vmatprep.mubr.msk.f32.mxu0 %vm213_vm1, %v61_v33  ;;  %v65_v41 = vld [vmem:[%s4071_s2 + $0xa0] sm:$0xff]  ;;  %v66_v43 = vld [vmem:[%s4071_s2 + $0xa8] sm:$0xff]  ;;  %v67_v45 = vld [vmem:[%s4071_s2 + $0xb0] sm:$0xff] }
  0x22   :  { %972 = vperm.xlu0 %3357, %v2750_v34   ;;  %977 = vperm.xlu1 %3358, %v2751_v36   ;;  %v77_v42 = vld [vmem:[%s4072_s3 + $0x40] sm:$0xff]  ;;  %v78_v44 = vld [vmem:[%s4072_s3 + $0x48] sm:$0xff]  ;;  %v79_v46 = vld [vmem:[%s4072_s3 + $0x50] sm:$0xff] }
  0x23   :  { %v68_v47 = vld [vmem:[%s4071_s2 + $0xb8] sm:$0xff]  ;;  %v2709_v49 = vld [vmem:[%s4073_s4 + $0x40] sm:$0xff]  ;;  %v2710_v51 = vld [vmem:[%s4073_s4 + $0x48] sm:$0xff] }
  0x24   :  { %3011 = vmatmul.mubr.msk.f32.gmra.mrb[16].mxu0 %vm213_vm1, %v62_v35  ;;  %v80_v48 = vld [vmem:[%s4072_s3 + $0x58] sm:$0xff]  ;;  %v2776_v50 = vld [vmem:[%s4076_s7 + $0x40] sm:$0xff]  ;;  %v2777_v52 = vld [vmem:[%s4076_s7 + $0x48] sm:$0xff] }
  0x25   :  { %3013 = vmatprep.mubr.msk.f32.mxu0 %vm213_vm1, %v63_v37  ;;  %v2711_v53 = vld [vmem:[%s4073_s4 + $0x50] sm:$0xff]  ;;  %v2712_v55 = vld [vmem:[%s4073_s4 + $0x58] sm:$0xff]  ;;  %v2785_v57 = vld [vmem:[%s4078_s9 + $0x8] sm:$0x3f] }
  0x26   :  { %982 = vperm.xlu0 %3357, %v2752_v38   ;;  %1092 = vperm.xlu1 %3358, %v2758_v40   ;;  %v2778_v54 = vld [vmem:[%s4076_s7 + $0x50] sm:$0xff]  ;;  %v2779_v56 = vld [vmem:[%s4076_s7 + $0x58] sm:$0xff]  ;;  %v81_v58 = vld [vmem:[%s4072_s3 + $0x60] sm:$0xff] }
  0x27   :  { %v82_v59 = vld [vmem:[%s4072_s3 + $0x68] sm:$0xff]  ;;  %v83_v60 = vld [vmem:[%s4072_s3 + $0x70] sm:$0xff]  ;;  %v84_v61 = vld [vmem:[%s4072_s3 + $0x78] sm:$0xff] }
  0x28   :  { %3014 = vmatmul.mubr.msk.f32.gmra.mrb[18].mxu0 %vm213_vm1, %v64_v39  ;;  %v2803_v62 = vld [vmem:[%s4076_s7 + $0x60] sm:$0xff]  ;;  %v2804_v63 = vld [vmem:[%s4076_s7 + $0x68] sm:$0xff]  ;;  %v2805_v0 = vld [vmem:[%s4076_s7 + $0x70] sm:$0xff] }
  0x29   :  { %3016 = vmatprep.mubr.msk.f32.mxu0 %vm213_vm1, %v65_v41  ;;  %v2806_v1 = vld [vmem:[%s4076_s7 + $0x78] sm:$0xff]  ;;  %v2812_v2 = vld [vmem:[%s4080_s11 + $0x4] sm:$0xf]  ;;  %v70_v5 = vld [vmem:[%s4072_s3 + $0x8] sm:$0xff] }
  0x2a   :  { %135 = vperm.xlu0 %3357, %v77_v42   ;;  %140 = vperm.xlu1 %3358, %v78_v44   ;;  %v69_v3 = vld [vmem:[%s4072_s3] sm:$0xff]  ;;  %v71_v6 = vld [vmem:[%s4072_s3 + $0x10] sm:$0xff]  ;;  %v72_v7 = vld [vmem:[%s4072_s3 + $0x18] sm:$0xff]  ;;  %v3444_v44 = vmov 0.0|0.0  }
  0x2b   :  { %v2056_v8 = vld [vmem:[%s4076_s7] sm:$0xff]  ;;  %v2057_v9 = vld [vmem:[%s4076_s7 + $0x8] sm:$0xff]  ;;  %v2058_v10 = vld [vmem:[%s4076_s7 + $0x10] sm:$0xff] }
  0x2c   :  { %3017 = vmatmul.mubr.msk.f32.gmra.mrb[20].mxu0 %vm213_vm1, %v66_v43  ;;  %v2059_v11 = vld [vmem:[%s4076_s7 + $0x18] sm:$0xff]  ;;  %v2182_v12 = vld [vmem:[%s4078_s9] sm:$0x3f]  ;;  %v74_v14 = vld [vmem:[%s4072_s3 + $0x28] sm:$0xff] }
  0x2d   :  { %3019 = vmatprep.mubr.msk.f32.mxu0 %vm213_vm1, %v67_v45  ;;  %v73_v13 = vld [vmem:[%s4072_s3 + $0x20] sm:$0xff]  ;;  %v75_v15 = vld [vmem:[%s4072_s3 + $0x30] sm:$0xff]  ;;  %v76_v16 = vld [vmem:[%s4072_s3 + $0x38] sm:$0xff]  ;;  %v3446_v45 = vmov 0.0  }
  0x2e   :  { %145 = vperm.xlu0 %3357, %v79_v46   ;;  %150 = vperm.xlu1 %3358, %v80_v48   ;;  %v2839_v17 = vld [vmem:[%s4076_s7 + $0x20] sm:$0xff]  ;;  %v2840_v18 = vld [vmem:[%s4076_s7 + $0x28] sm:$0xff]  ;;  %v2841_v19 = vld [vmem:[%s4076_s7 + $0x30] sm:$0xff] }
  0x2f   :  { %v2842_v20 = vld [vmem:[%s4076_s7 + $0x38] sm:$0xff]  ;;  %v2545_v21 = vld [vmem:[%s4080_s11] sm:$0xf]  ;;  %v2719_v41 = vld [vmem:[%s4075_s6 + $0x88] sm:$0xff] }
  0x30   :  { %3020 = vmatmul.mubr.msk.f32.gmra.mrb[22].mxu0 %vm213_vm1, %v68_v47  ;;  %v2718_v22 = vld [vmem:[%s4075_s6 + $0x80] sm:$0xff]  ;;  %v2720_v42 = vld [vmem:[%s4075_s6 + $0x90] sm:$0xff]  ;;  %v2721_v43 = vld [vmem:[%s4075_s6 + $0x98] sm:$0xff] }
  0x31   :  { %3024 = vmatprep.mubr.msk.f32.mxu0 %vm480_vm3, %v2709_v49  ;;  %3038 = vmatprep.mubr.msk.f32.mxu1 %vm616_vm4, %v2718_v22 }
  0x32   :  { %1333 = vperm.xlu0 %3357, %v2776_v50   ;;  %1338 = vperm.xlu1 %3358, %v2777_v52  }
  0x34   :  { %3025 = vmatmul.mubr.msk.f32.vlgmr.msra.gmra.mrb[16].mxu0 %vm480_vm3, %v2710_v51 }
  0x35   :  { %3027 = vmatprep.mubr.msk.f32.mxu0 %vm480_vm3, %v2711_v53 }
  0x36   :  { %1343 = vperm.xlu0 %3357, %v2778_v54   ;;  %1348 = vperm.xlu1 %3358, %v2779_v56  }
  0x38   :  { %3028 = vmatmul.mubr.msk.f32.gmra.mrb[18].mxu0 %vm480_vm3, %v2712_v55 }
  0x3a   :  { %1458 = vperm.xlu0 %3357, %v2785_v57   ;;  %155 = vperm.xlu1 %3358, %v81_v58  }
  0x3e   :  { %160 = vperm.xlu0 %3357, %v82_v59   ;;  %165 = vperm.xlu1 %3358, %v83_v60  }
  0x42   :  { %170 = vperm.xlu0 %3357, %v84_v61   ;;  %1699 = vperm.xlu1 %3358, %v2803_v62  }
  0x46   :  { %1704 = vperm.xlu0 %3357, %v2804_v63   ;;  %1709 = vperm.xlu1 %3358, %v2805_v0   ;;  %v2730_v0 = vld [vmem:[%s4077_s8 + $0x10] sm:$0x3f] }
  0x4a   :  { %1714 = vperm.xlu0 %3357, %v2806_v1   ;;  %1824 = vperm.xlu1 %3358, %v2812_v2   ;;  %v2736_v1 = vld [vmem:[%s4074_s5 + $0x40] sm:$0xff] }
  0x4b   :  { %3057 = vmatprep.mubr.msk.f32.mxu0 %vm849_vm6, %v2736_v1 }
  0x4e   :  { %95 = vperm.xlu0 %3357, %v69_v3   ;;  %100 = vperm.xlu1 %3358, %v70_v5  }
  0x52   :  { %105 = vperm.xlu0 %3357, %v71_v6   ;;  %110 = vperm.xlu1 %3358, %v72_v7  }
  0x56   :  { %2062 = vperm.xlu0 %3357, %v2056_v8   ;;  %2067 = vperm.xlu1 %3358, %v2057_v9  }
  0x5a   :  { %2072 = vperm.xlu0 %3357, %v2058_v10   ;;  %2077 = vperm.xlu1 %3358, %v2059_v11  }
  0x5e   :  { %2185 = vperm.xlu0 %3357, %v2182_v12   ;;  %115 = vperm.xlu1 %3358, %v73_v13  }
  0x62   :  { %120 = vperm.xlu0 %3357, %v74_v14   ;;  %125 = vperm.xlu1 %3358, %v75_v15  }
  0x66   :  { %130 = vperm.xlu0 %3357, %v76_v16   ;;  %2425 = vperm.xlu1 %3358, %v2839_v17  }
  0x6a   :  { %2430 = vperm.xlu0 %3357, %v2840_v18   ;;  %2435 = vperm.xlu1 %3358, %v2841_v19  }
  0x6e   :  { %2440 = vperm.xlu0 %3357, %v2842_v20   ;;  %2548 = vperm.xlu1 %3358, %v2545_v21  }
  0x85   :  { %v176_v23 = vpop.permute.xlu0 %175  ;;  %v186_v24 = vpop.permute.xlu1 %185 }
  0x89   :  { %v181_v25 = vpop.permute.xlu0 %180  ;;  %v191_v31 = vpop.permute.xlu1 %190 }
  0x8d   :  { %v604_v46 = vpop.permute.xlu1 %603  ;;  %v599_v47 = vpop.permute.xlu0 %598 }
  0x91   :  { %v614_v53 = vpop.permute.xlu1 %613  ;;  %v609_v56 = vpop.permute.xlu0 %608 }
  0x95   :  { %v725_v2 = vpop.permute.xlu0 %724 }
 0x107   :  { %v3026_v26 = vpop.f32.mrb[16].mxu0 }
 0x108   :  { %v3320_v27 = vadd.f32 %v3026_v26, %v181_v25  ;;  %v563_v28 = vpop.f32.mrb[17].mxu0 }
 0x109   :  { %v3321_v29 = vadd.f32 %v563_v28, %v176_v23 }
 0x10a   :  { %v583_v30 = vmax.f32 %v3320_v27, 0.0 }
 0x10b   :  { %v582_v32 = vmax.f32 %v3321_v29, 0.0  ;;  %v3029_v33 = vpop.f32.mrb[18].mxu0 }
 0x10c   :  { %v3322_v34 = vadd.f32 %v3029_v33, %v191_v31  ;;  %v573_v35 = vpop.f32.mrb[19].mxu0 }
 0x10d   :  { %v3323_v36 = vadd.f32 %v573_v35, %v186_v24  ;;  %v3220_v37 = vpack.c.bf16 %v583_v30, %v582_v32 }
 0x10e   :  { %v585_v38 = vmax.f32 %v3322_v34, 0.0 }
 0x10f   :  { %v584_v39 = vmax.f32 %v3323_v36, 0.0  ;;  %3221 = vmatprep.subr.bf16.mxu1 %v3220_v37 }
 0x110   :  { %3223 = vmatpush3.bf16.msra.mxu1 %v3220_v37 }
 0x111   :  { %v3224_v40 = vpack.c.bf16 %v585_v38, %v584_v39 }
 0x113   :  { %3225 = vmatprep.subr.bf16.mxu1 %v3224_v40 }
 0x114   :  { %3227 = vmatpush3.bf16.msra.mxu1 %v3224_v40 }
 0x115   :  { %3228 = vmatprep.subr.bf16.mxu1 %v3444_v44 }
 0x117   :  { %3039 = vmatmul.mubr.msk.f32.vlgmr.msra.gmra.mrb[0].mxu1 %vm616_vm4, %v2719_v41 }
 0x118   :  { %3041 = vmatprep.mubr.msk.f32.mxu1 %vm616_vm4, %v2720_v42 }
 0x11b   :  { %3042 = vmatmul.mubr.msk.f32.gmra.mrb[2].mxu1 %vm616_vm4, %v2721_v43 }
 0x11c   :  { %3052 = vmatprep.mubr.msk.f32.mxu1 %vm3445_vm5, %v3446_v45 }
 0x1ea   :  { %v3040_v48 = vpop.f32.mrb[0].mxu1 }
 0x1eb   :  { %v701_v49 = vadd.f32 %v3040_v48, %v604_v46  ;;  %v695_v50 = vpop.f32.mrb[1].mxu1  ;;  %v43_v48 = vld [vmem:[%s4069_s0 + $0x2] sm:$0x7] }
 0x1ec   :  { %v696_v51 = vadd.f32 %v695_v50, %v599_v47 }
 0x1ed   :  { %v715_v52 = vmax.f32 %v701_v49, 0.0 }
 0x1ee   :  { %v714_v54 = vmax.f32 %v696_v51, 0.0  ;;  %v3043_v55 = vpop.f32.mrb[2].mxu1 }
 0x1ef   :  { %v711_v57 = vadd.f32 %v3043_v55, %v614_v53  ;;  %v705_v58 = vpop.f32.mrb[3].mxu1  ;;  %v2738_v53 = vld [vmem:[%s4074_s5 + $0x50] sm:$0xff]  ;;  %v2745_v55 = vld [vmem:[%s4075_s6 + $0xa0] sm:$0xff] }
 0x1f0   :  { %v3229_v59 = vpack.c.bf16 %v715_v52, %v714_v54  ;;  %v706_v60 = vadd.f32 %v705_v58, %v609_v56  ;;  %v2737_v52 = vld [vmem:[%s4074_s5 + $0x48] sm:$0xff]  ;;  %v2739_v54 = vld [vmem:[%s4074_s5 + $0x58] sm:$0xff]  ;;  %v201_v56 = vpop.permute.xlu0 %200 }
 0x1f1   :  { %v717_v61 = vmax.f32 %v711_v57, 0.0  ;;  %v196_v57 = vpop.permute.xlu1 %195 }
 0x1f2   :  { %v716_v62 = vmax.f32 %v706_v60, 0.0  ;;  %3230 = vmatpush3.bf16.msra.mxu1 %v3229_v59 }
 0x1f3   :  { %3231 = vmatprep.subr.bf16.mxu1 %v3444_v44 }
 0x1f4   :  { %v3232_v63 = vpack.c.bf16 %v717_v61, %v716_v62 }
 0x1f6   :  { %3233 = vmatpush3.bf16.msra.mxu1 %v3232_v63  ;;  %v211_v63 = vpop.permute.xlu0 %210 }
 0x1f9   :  { %3053 = vmatmul.mubr.msk.f32.vlgmr.msra.gmra.mrb[4].mxu1 %vm616_vm4, %v2730_v0 }
 0x1fa   :  { %3071 = vmatprep.mubr.msk.f32.mxu1 %vm616_vm4, %v2745_v55 }
 0x2cc   :  { %v796_v3 = vpop.f32.mrb[4].mxu1 }
 0x2cd   :  { %v797_v5 = vadd.f32 %v796_v3, %v725_v2  ;;  %v3054_v6 = vpop.f32.mrb[5].mxu1  ;;  %v206_v2 = vpop.permute.xlu1 %205 }
 0x2cf   :  { %v804_v7 = vmul.f32 0.71428573, %v797_v5  ;;  %v801_v47 = vrot.slane %v797_v5, 3 }
 0x2d1   :  { %v805_v8 = vmul.f32 %v804_v7, %v804_v7  ;;  %v803_v49 = vsub.f32 %v43_v48, %v801_v47 }
 0x2d3   :  { %v806_v9 = vadd.f32 1.0, %v805_v8 }
 0x2d5   :  { %3359 = vrsqrt.f32 %v806_v9 }
 0x2df   :  { %v3360_v10 = vpop.eup %3359 }
 0x2e0   :  { %v808_v11 = vadd.f32 1.0, %v3360_v10  ;;  %v813_v16 = vmul.f32 %v3360_v10, %v804_v7 }
 0x2e2   :  { %3361 = vrcp.f32 %v808_v11 }
 0x2ec   :  { %v3362_v12 = vpop.eup %3361 }
 0x2ed   :  { %v810_v13 = vmul.f32 %v3362_v12, %v808_v11  ;;  %v2746_v11 = vld [vmem:[%s4075_s6 + $0xa8] sm:$0xff] }
 0x2ef   :  { %v811_v14 = vsub.f32 2.0, %v810_v13  ;;  %v2748_v13 = vld [vmem:[%s4075_s6 + $0xb8] sm:$0xff] }
 0x2f1   :  { %v812_v15 = vmul.f32 %v3362_v12, %v811_v14  ;;  %v2747_v12 = vld [vmem:[%s4075_s6 + $0xb0] sm:$0xff]  ;;  %v973_v14 = vpop.permute.xlu0 %972 }
 0x2f3   :  { %v814_v17 = vmul.f32 %v813_v16, %v812_v15  ;;  %v968_v15 = vpop.permute.xlu1 %967 }
 0x2f5   :  { %v815_v18 = vmul.f32 %v814_v17, %v814_v17 }
 0x2f7   :  { %v816_v19 = vadd.f32 1.0, %v815_v18 }
 0x2f9   :  { %3363 = vrsqrt.f32 %v816_v19 }
 0x303   :  { %v3364_v20 = vpop.eup %3363 }
 0x304   :  { %v818_v21 = vadd.f32 1.0, %v3364_v20  ;;  %v823_v26 = vmul.f32 %v3364_v20, %v814_v17 }
 0x306   :  { %3365 = vrcp.f32 %v818_v21 }
 0x310   :  { %v3366_v22 = vpop.eup %3365 }
 0x311   :  { %v820_v23 = vmul.f32 %v3366_v22, %v818_v21  ;;  %v983_v21 = vpop.permute.xlu0 %982 }
 0x313   :  { %v821_v24 = vsub.f32 2.0, %v820_v23 }
 0x315   :  { %v822_v25 = vmul.f32 %v3366_v22, %v821_v24  ;;  %v978_v24 = vpop.permute.xlu1 %977 }
 0x317   :  { %v824_v27 = vmul.f32 %v823_v26, %v822_v25 }
 0x319   :  { %v825_v28 = vmul.f32 %v824_v27, %v824_v27 }
 0x31b   :  { %v826_v29 = vmul.f32 0.07692308, %v825_v28 }
 0x31d   :  { %v2733_v30 = vadd.f32 -0.09090909, %v826_v29 }
 0x31f   :  { %v828_v31 = vmul.f32 %v2733_v30, %v825_v28 }
 0x321   :  { %v829_v32 = vadd.f32 0.11111111, %v828_v31 }
 0x323   :  { %v830_v33 = vmul.f32 %v829_v32, %v825_v28  ;;  %v2757_v32 = vld [vmem:[%s4079_s10 + $0x8] sm:$0xf] }
 0x325   :  { %v2734_v34 = vadd.f32 -0.14285715, %v830_v33  ;;  %v2763_v33 = vld [vmem:[%s4073_s4 + $0x20] sm:$0xff] }
 0x327   :  { %v832_v35 = vmul.f32 %v2734_v34, %v825_v28  ;;  %v1093_v34 = vpop.permute.xlu1 %1092 }
 0x329   :  { %v833_v36 = vadd.f32 0.2, %v832_v35 }
 0x32b   :  { %v834_v37 = vmul.f32 %v833_v36, %v825_v28 }
 0x32d   :  { %v2735_v38 = vadd.f32 -0.33333334, %v834_v37 }
 0x32f   :  { %v836_v39 = vmul.f32 %v2735_v38, %v825_v28 }
 0x331   :  { %v837_v40 = vadd.f32 1.0, %v836_v39 }
 0x333   :  { %v838_v41 = vmul.f32 %v837_v40, %v824_v27 }
 0x335   :  { %v839_v42 = vmul.f32 4.0, %v838_v41 }
 0x337   :  { %v840_v43 = vmul.f32 -0.8904, %v839_v42 }
 0x339   :  { %v841_v46 = vmul.f32 1.442695, %v840_v43 }
 0x33b   :  { %3367 = vpow2.f32 %v841_v46 }
 0x345   :  { %v3368_v50 = vpop.eup %3367 }
 0x346   :  { %v3830_v51 = vmul.f32 %v3368_v50, %v803_v49 }
 0x348   :  { %3055 = vmatprep.subr.msk.mxu0 %vm862_vm7, %v3830_v51 }
 0x349   :  { %3056 = vmatpush3.msk.msra.mxu0 %vm862_vm7, %v3830_v51 }
 0x34a   :  { %3058 = vmatmul.mubr.msk.f32.vlgmr.msra.gmra.mrb[20].mxu0 %vm849_vm6, %v2737_v52 }
 0x34b   :  { %3060 = vmatprep.mubr.msk.f32.mxu0 %vm849_vm6, %v2738_v53 }
 0x34e   :  { %3061 = vmatmul.mubr.msk.f32.gmra.mrb[22].mxu0 %vm849_vm6, %v2739_v54 }
 0x34f   :  { %3090 = vmatprep.mubr.msk.f32.mxu0 %vm480_vm3, %v2763_v33 }
 0x41d   :  { %v3059_v58 = vpop.f32.mrb[20].mxu0 }
 0x41e   :  { %v3324_v59 = vadd.f32 %v3059_v58, %v201_v56  ;;  %v932_v60 = vpop.f32.mrb[21].mxu0 }
 0x41f   :  { %v3325_v61 = vadd.f32 %v932_v60, %v196_v57 }
 0x420   :  { %v952_v62 = vmax.f32 %v3324_v59, 0.0 }
 0x421   :  { %v951_v0 = vmax.f32 %v3325_v61, 0.0  ;;  %v3062_v1 = vpop.f32.mrb[22].mxu0 }
 0x422   :  { %v3326_v3 = vadd.f32 %v3062_v1, %v211_v63  ;;  %v942_v5 = vpop.f32.mrb[23].mxu0 }
 0x423   :  { %v3234_v6 = vpack.c.bf16 %v952_v62, %v951_v0  ;;  %v3327_v7 = vadd.f32 %v942_v5, %v206_v2 }
 0x424   :  { %v954_v8 = vmax.f32 %v3326_v3, 0.0 }
 0x425   :  { %v953_v9 = vmax.f32 %v3327_v7, 0.0  ;;  %3235 = vmatprep.subr.bf16.mxu1 %v3234_v6 }
 0x426   :  { %3237 = vmatpush3.bf16.msra.mxu1 %v3234_v6 }
 0x427   :  { %v3238_v10 = vpack.c.bf16 %v954_v8, %v953_v9 }
 0x429   :  { %3239 = vmatprep.subr.bf16.mxu1 %v3238_v10 }
 0x42a   :  { %3241 = vmatpush3.bf16.msra.mxu1 %v3238_v10 }
 0x42b   :  { %3242 = vmatprep.subr.bf16.mxu1 %v3444_v44 }
 0x42d   :  { %3072 = vmatmul.mubr.msk.f32.vlgmr.msra.gmra.mrb[6].mxu1 %vm616_vm4, %v2746_v11 }
 0x42e   :  { %3074 = vmatprep.mubr.msk.f32.mxu1 %vm616_vm4, %v2747_v12 }
 0x431   :  { %3075 = vmatmul.mubr.msk.f32.gmra.mrb[8].mxu1 %vm616_vm4, %v2748_v13 }
 0x432   :  { %3085 = vmatprep.mubr.msk.f32.mxu1 %vm3445_vm5, %v3446_v45 }
 0x500   :  { %v3073_v16 = vpop.f32.mrb[6].mxu1 }
 0x501   :  { %v1069_v17 = vadd.f32 %v3073_v16, %v973_v14  ;;  %v1063_v18 = vpop.f32.mrb[7].mxu1 }
 0x502   :  { %v1064_v19 = vadd.f32 %v1063_v18, %v968_v15 }
 0x503   :  { %v1083_v20 = vmax.f32 %v1069_v17, 0.0 }
 0x504   :  { %v1082_v22 = vmax.f32 %v1064_v19, 0.0  ;;  %v3076_v23 = vpop.f32.mrb[8].mxu1 }
 0x505   :  { %v1079_v25 = vadd.f32 %v3076_v23, %v983_v21  ;;  %v1073_v26 = vpop.f32.mrb[9].mxu1  ;;  %v2765_v21 = vld [vmem:[%s4073_s4 + $0x30] sm:$0xff]  ;;  %v141_v23 = vpop.permute.xlu1 %140 }
 0x506   :  { %v3243_v27 = vpack.c.bf16 %v1083_v20, %v1082_v22  ;;  %v1074_v28 = vadd.f32 %v1073_v26, %v978_v24  ;;  %v2764_v20 = vld [vmem:[%s4073_s4 + $0x28] sm:$0xff]  ;;  %v2772_v22 = vld [vmem:[%s4075_s6 + $0x40] sm:$0xff]  ;;  %v136_v24 = vpop.permute.xlu0 %135 }
 0x507   :  { %v1085_v29 = vmax.f32 %v1079_v25, 0.0 }
 0x508   :  { %v1084_v30 = vmax.f32 %v1074_v28, 0.0  ;;  %3244 = vmatpush3.bf16.msra.mxu1 %v3243_v27 }
 0x509   :  { %3245 = vmatprep.subr.bf16.mxu1 %v3444_v44 }
 0x50a   :  { %v3246_v31 = vpack.c.bf16 %v1085_v29, %v1084_v30  ;;  %v151_v30 = vpop.permute.xlu1 %150  ;;  %v146_v33 = vpop.permute.xlu0 %145 }
 0x50c   :  { %3247 = vmatpush3.bf16.msra.mxu1 %v3246_v31 }
 0x50f   :  { %3086 = vmatmul.mubr.msk.f32.vlgmr.msra.gmra.mrb[10].mxu1 %vm616_vm4, %v2757_v32 }
 0x510   :  { %3104 = vmatprep.mubr.msk.f32.mxu1 %vm616_vm4, %v2772_v22 }
 0x5e2   :  { %v1164_v35 = vpop.f32.mrb[10].mxu1 }
 0x5e3   :  { %v1165_v36 = vadd.f32 %v1164_v35, %v1093_v34  ;;  %v3087_v37 = vpop.f32.mrb[11].mxu1 }
 0x5e5   :  { %v1172_v38 = vmul.f32 0.71428573, %v1165_v36  ;;  %v1169_v16 = vrot.slane %v1165_v36, 2 }
 0x5e7   :  { %v1173_v39 = vmul.f32 %v1172_v38, %v1172_v38  ;;  %v1171_v17 = vsub.f32 %v3529_v4, %v1169_v16  ;;  %v2766_v4 = vld [vmem:[%s4073_s4 + $0x38] sm:$0xff] }
 0x5e9   :  { %v1174_v40 = vadd.f32 1.0, %v1173_v39 }
 0x5eb   :  { %3369 = vrsqrt.f32 %v1174_v40 }
 0x5f5   :  { %v3370_v41 = vpop.eup %3369 }
 0x5f6   :  { %v1176_v42 = vadd.f32 1.0, %v3370_v41  ;;  %v1181_v49 = vmul.f32 %v3370_v41, %v1172_v38  ;;  %v2773_v41 = vld [vmem:[%s4075_s6 + $0x48] sm:$0xff] }
 0x5f8   :  { %3371 = vrcp.f32 %v1176_v42 }
 0x602   :  { %v3372_v43 = vpop.eup %3371 }
 0x603   :  { %v1178_v46 = vmul.f32 %v3372_v43, %v1176_v42  ;;  %v2774_v42 = vld [vmem:[%s4075_s6 + $0x50] sm:$0xff] }
 0x605   :  { %v1179_v47 = vsub.f32 2.0, %v1178_v46  ;;  %v1339_v46 = vpop.permute.xlu1 %1338 }
 0x607   :  { %v1180_v48 = vmul.f32 %v3372_v43, %v1179_v47  ;;  %v2775_v43 = vld [vmem:[%s4075_s6 + $0x58] sm:$0xff]  ;;  %v1334_v47 = vpop.permute.xlu0 %1333 }
 0x609   :  { %v1182_v50 = vmul.f32 %v1181_v49, %v1180_v48 }
 0x60b   :  { %v1183_v52 = vmul.f32 %v1182_v50, %v1182_v50 }
 0x60d   :  { %v1184_v53 = vadd.f32 1.0, %v1183_v52 }
 0x60f   :  { %3373 = vrsqrt.f32 %v1184_v53 }
 0x619   :  { %v3374_v54 = vpop.eup %3373 }
 0x61a   :  { %v1186_v55 = vadd.f32 1.0, %v3374_v54  ;;  %v1191_v60 = vmul.f32 %v3374_v54, %v1182_v50  ;;  %v1349_v54 = vpop.permute.xlu1 %1348 }
 0x61c   :  { %3375 = vrcp.f32 %v1186_v55 }
 0x626   :  { %v3376_v56 = vpop.eup %3375 }
 0x627   :  { %v1188_v57 = vmul.f32 %v3376_v56, %v1186_v55 }
 0x629   :  { %v1189_v58 = vsub.f32 2.0, %v1188_v57  ;;  %v1344_v57 = vpop.permute.xlu0 %1343 }
 0x62b   :  { %v1190_v59 = vmul.f32 %v3376_v56, %v1189_v58 }
 0x62d   :  { %v1192_v61 = vmul.f32 %v1191_v60, %v1190_v59 }
 0x62f   :  { %v1193_v62 = vmul.f32 %v1192_v61, %v1192_v61 }
 0x631   :  { %v1194_v63 = vmul.f32 0.07692308, %v1193_v62 }
 0x633   :  { %v2760_v0 = vadd.f32 -0.09090909, %v1194_v63 }
 0x635   :  { %v1196_v1 = vmul.f32 %v2760_v0, %v1193_v62 }
 0x637   :  { %v1197_v2 = vadd.f32 0.11111111, %v1196_v1  ;;  %v2784_v1 = vld [vmem:[%s4077_s8 + $0x8] sm:$0x3f] }
 0x639   :  { %v1198_v3 = vmul.f32 %v1197_v2, %v1193_v62  ;;  %v2790_v2 = vld [vmem:[%s4074_s5 + $0x20] sm:$0xff] }
 0x63b   :  { %v2761_v5 = vadd.f32 -0.14285715, %v1198_v3  ;;  %v1459_v3 = vpop.permute.xlu0 %1458 }
 0x63d   :  { %v1200_v6 = vmul.f32 %v2761_v5, %v1193_v62 }
 0x63f   :  { %v1201_v7 = vadd.f32 0.2, %v1200_v6 }
 0x641   :  { %v1202_v8 = vmul.f32 %v1201_v7, %v1193_v62 }
 0x643   :  { %v2762_v9 = vadd.f32 -0.33333334, %v1202_v8 }
 0x645   :  { %v1204_v10 = vmul.f32 %v2762_v9, %v1193_v62 }
 0x647   :  { %v1205_v11 = vadd.f32 1.0, %v1204_v10 }
 0x649   :  { %v1206_v12 = vmul.f32 %v1205_v11, %v1192_v61 }
 0x64b   :  { %v1207_v13 = vmul.f32 4.0, %v1206_v12 }
 0x64d   :  { %v1208_v14 = vmul.f32 -0.8904, %v1207_v13 }
 0x64f   :  { %v1209_v15 = vmul.f32 1.442695, %v1208_v14 }
 0x651   :  { %3377 = vpow2.f32 %v1209_v15 }
 0x65b   :  { %v3378_v18 = vpop.eup %3377 }
 0x65c   :  { %v3877_v19 = vmul.f32 %v3378_v18, %v1171_v17 }
 0x65e   :  { %3088 = vmatprep.subr.msk.mxu0 %vm493_vm2, %v3877_v19 }
 0x65f   :  { %3089 = vmatpush3.msk.msra.mxu0 %vm493_vm2, %v3877_v19 }
 0x660   :  { %3091 = vmatmul.mubr.msk.f32.vlgmr.msra.gmra.mrb[8].mxu0 %vm480_vm3, %v2764_v20 }
 0x661   :  { %3093 = vmatprep.mubr.msk.f32.mxu0 %vm480_vm3, %v2765_v21 }
 0x664   :  { %3094 = vmatmul.mubr.msk.f32.gmra.mrb[10].mxu0 %vm480_vm3, %v2766_v4 }
 0x665   :  { %3123 = vmatprep.mubr.msk.f32.mxu0 %vm849_vm6, %v2790_v2 }
 0x733   :  { %v3092_v25 = vpop.f32.mrb[8].mxu0 }
 0x734   :  { %v3312_v26 = vadd.f32 %v3092_v25, %v141_v23  ;;  %v1298_v27 = vpop.f32.mrb[9].mxu0 }
 0x735   :  { %v3313_v28 = vadd.f32 %v1298_v27, %v136_v24 }
 0x736   :  { %v1318_v29 = vmax.f32 %v3312_v26, 0.0 }
 0x737   :  { %v1317_v31 = vmax.f32 %v3313_v28, 0.0  ;;  %v3095_v32 = vpop.f32.mrb[10].mxu0 }
 0x738   :  { %v3314_v34 = vadd.f32 %v3095_v32, %v151_v30  ;;  %v1308_v35 = vpop.f32.mrb[11].mxu0 }
 0x739   :  { %v3248_v36 = vpack.c.bf16 %v1318_v29, %v1317_v31  ;;  %v3315_v37 = vadd.f32 %v1308_v35, %v146_v33 }
 0x73a   :  { %v1320_v38 = vmax.f32 %v3314_v34, 0.0 }
 0x73b   :  { %v1319_v39 = vmax.f32 %v3315_v37, 0.0  ;;  %3249 = vmatprep.subr.bf16.mxu1 %v3248_v36 }
 0x73c   :  { %3251 = vmatpush3.bf16.msra.mxu1 %v3248_v36 }
 0x73d   :  { %v3252_v40 = vpack.c.bf16 %v1320_v38, %v1319_v39 }
 0x73f   :  { %3253 = vmatprep.subr.bf16.mxu1 %v3252_v40 }
 0x740   :  { %3255 = vmatpush3.bf16.msra.mxu1 %v3252_v40 }
 0x741   :  { %3256 = vmatprep.subr.bf16.mxu1 %v3444_v44 }
 0x743   :  { %3105 = vmatmul.mubr.msk.f32.vlgmr.msra.gmra.mrb[12].mxu1 %vm616_vm4, %v2773_v41 }
 0x744   :  { %3107 = vmatprep.mubr.msk.f32.mxu1 %vm616_vm4, %v2774_v42 }
 0x747   :  { %3108 = vmatmul.mubr.msk.f32.gmra.mrb[14].mxu1 %vm616_vm4, %v2775_v43 }
 0x748   :  { %3118 = vmatprep.mubr.msk.f32.mxu1 %vm3445_vm5, %v3446_v45 }
 0x816   :  { %v3106_v48 = vpop.f32.mrb[12].mxu1 }
 0x817   :  { %v1435_v49 = vadd.f32 %v3106_v48, %v1339_v46  ;;  %v1429_v50 = vpop.f32.mrb[13].mxu1 }
 0x818   :  { %v1430_v52 = vadd.f32 %v1429_v50, %v1334_v47 }
 0x819   :  { %v1449_v53 = vmax.f32 %v1435_v49, 0.0 }
 0x81a   :  { %v1448_v55 = vmax.f32 %v1430_v52, 0.0  ;;  %v3109_v56 = vpop.f32.mrb[14].mxu1 }
 0x81b   :  { %v1445_v58 = vadd.f32 %v3109_v56, %v1349_v54  ;;  %v1439_v59 = vpop.f32.mrb[15].mxu1  ;;  %v2792_v54 = vld [vmem:[%s4074_s5 + $0x30] sm:$0xff]  ;;  %v161_v56 = vpop.permute.xlu0 %160 }
 0x81c   :  { %v3257_v60 = vpack.c.bf16 %v1449_v53, %v1448_v55  ;;  %v1440_v61 = vadd.f32 %v1439_v59, %v1344_v57  ;;  %v2791_v53 = vld [vmem:[%s4074_s5 + $0x28] sm:$0xff]  ;;  %v2799_v55 = vld [vmem:[%s4075_s6 + $0x60] sm:$0xff]  ;;  %v156_v57 = vpop.permute.xlu1 %155 }
 0x81d   :  { %v1451_v62 = vmax.f32 %v1445_v58, 0.0 }
 0x81e   :  { %v1450_v63 = vmax.f32 %v1440_v61, 0.0  ;;  %3258 = vmatpush3.bf16.msra.mxu1 %v3257_v60 }
 0x81f   :  { %3259 = vmatprep.subr.bf16.mxu1 %v3444_v44 }
 0x820   :  { %v3260_v0 = vpack.c.bf16 %v1451_v62, %v1450_v63  ;;  %v171_v63 = vpop.permute.xlu0 %170  ;;  %v166_v2 = vpop.permute.xlu1 %165 }
 0x822   :  { %3261 = vmatpush3.bf16.msra.mxu1 %v3260_v0 }
 0x825   :  { %3119 = vmatmul.mubr.msk.f32.vlgmr.msra.gmra.mrb[16].mxu1 %vm616_vm4, %v2784_v1 }
 0x826   :  { %3137 = vmatprep.mubr.msk.f32.mxu1 %vm616_vm4, %v2799_v55 }
 0x8f8   :  { %v1530_v5 = vpop.f32.mrb[16].mxu1 }
 0x8f9   :  { %v1531_v6 = vadd.f32 %v1530_v5, %v1459_v3  ;;  %v3120_v7 = vpop.f32.mrb[17].mxu1 }
 0x8fb   :  { %v1538_v8 = vmul.f32 0.71428573, %v1531_v6  ;;  %v1535_v48 = vrot.slane %v1531_v6, 3 }
 0x8fd   :  { %v1539_v9 = vmul.f32 %v1538_v8, %v1538_v8  ;;  %v1537_v49 = vsub.f32 %v3830_v51, %v1535_v48  ;;  %v2793_v51 = vld [vmem:[%s4074_s5 + $0x38] sm:$0xff] }
 0x8ff   :  { %v1540_v10 = vadd.f32 1.0, %v1539_v9 }
 0x901   :  { %3379 = vrsqrt.f32 %v1540_v10 }
 0x90b   :  { %v3380_v11 = vpop.eup %3379 }
 0x90c   :  { %v1542_v12 = vadd.f32 1.0, %v3380_v11  ;;  %v1547_v17 = vmul.f32 %v3380_v11, %v1538_v8  ;;  %v2800_v11 = vld [vmem:[%s4075_s6 + $0x68] sm:$0xff] }
 0x90e   :  { %3381 = vrcp.f32 %v1542_v12 }
 0x918   :  { %v3382_v13 = vpop.eup %3381 }
 0x919   :  { %v1544_v14 = vmul.f32 %v3382_v13, %v1542_v12  ;;  %v2801_v12 = vld [vmem:[%s4075_s6 + $0x70] sm:$0xff] }
 0x91b   :  { %v1545_v15 = vsub.f32 2.0, %v1544_v14  ;;  %v1705_v14 = vpop.permute.xlu0 %1704 }
 0x91d   :  { %v1546_v16 = vmul.f32 %v3382_v13, %v1545_v15  ;;  %v2802_v13 = vld [vmem:[%s4075_s6 + $0x78] sm:$0xff]  ;;  %v1700_v15 = vpop.permute.xlu1 %1699 }
 0x91f   :  { %v1548_v18 = vmul.f32 %v1547_v17, %v1546_v16 }
 0x921   :  { %v1549_v20 = vmul.f32 %v1548_v18, %v1548_v18 }
 0x923   :  { %v1550_v21 = vadd.f32 1.0, %v1549_v20 }
 0x925   :  { %3383 = vrsqrt.f32 %v1550_v21 }
 0x92f   :  { %v3384_v4 = vpop.eup %3383 }
 0x930   :  { %v1552_v22 = vadd.f32 1.0, %v3384_v4  ;;  %v1557_v27 = vmul.f32 %v3384_v4, %v1548_v18  ;;  %v1715_v4 = vpop.permute.xlu0 %1714 }
 0x932   :  { %3385 = vrcp.f32 %v1552_v22 }
 0x93c   :  { %v3386_v23 = vpop.eup %3385 }
 0x93d   :  { %v1554_v24 = vmul.f32 %v3386_v23, %v1552_v22 }
 0x93f   :  { %v1555_v25 = vsub.f32 2.0, %v1554_v24  ;;  %v1710_v24 = vpop.permute.xlu1 %1709 }
 0x941   :  { %v1556_v26 = vmul.f32 %v3386_v23, %v1555_v25 }
 0x943   :  { %v1558_v28 = vmul.f32 %v1557_v27, %v1556_v26 }
 0x945   :  { %v1559_v29 = vmul.f32 %v1558_v28, %v1558_v28 }
 0x947   :  { %v1560_v30 = vmul.f32 0.07692308, %v1559_v29 }
 0x949   :  { %v2787_v31 = vadd.f32 -0.09090909, %v1560_v30 }
 0x94b   :  { %v1562_v32 = vmul.f32 %v2787_v31, %v1559_v29 }
 0x94d   :  { %v1563_v33 = vadd.f32 0.11111111, %v1562_v32  ;;  %v2811_v32 = vld [vmem:[%s4079_s10 + $0x4] sm:$0xf] }
 0x94f   :  { %v1564_v34 = vmul.f32 %v1563_v33, %v1559_v29  ;;  %v1944_v33 = vld [vmem:[%s4073_s4] sm:$0xff] }
 0x951   :  { %v2788_v35 = vadd.f32 -0.14285715, %v1564_v34  ;;  %v1825_v34 = vpop.permute.xlu1 %1824 }
 0x953   :  { %v1566_v36 = vmul.f32 %v2788_v35, %v1559_v29 }
 0x955   :  { %v1567_v37 = vadd.f32 0.2, %v1566_v36 }
 0x957   :  { %v1568_v38 = vmul.f32 %v1567_v37, %v1559_v29 }
 0x959   :  { %v2789_v39 = vadd.f32 -0.33333334, %v1568_v38 }
 0x95b   :  { %v1570_v40 = vmul.f32 %v2789_v39, %v1559_v29 }
 0x95d   :  { %v1571_v41 = vadd.f32 1.0, %v1570_v40 }
 0x95f   :  { %v1572_v42 = vmul.f32 %v1571_v41, %v1558_v28 }
 0x961   :  { %v1573_v43 = vmul.f32 4.0, %v1572_v42 }
 0x963   :  { %v1574_v46 = vmul.f32 -0.8904, %v1573_v43 }
 0x965   :  { %v1575_v47 = vmul.f32 1.442695, %v1574_v46 }
 0x967   :  { %3387 = vpow2.f32 %v1575_v47 }
 0x971   :  { %v3388_v50 = vpop.eup %3387 }
 0x972   :  { %v3924_v52 = vmul.f32 %v3388_v50, %v1537_v49 }
 0x974   :  { %3121 = vmatprep.subr.msk.mxu0 %vm862_vm7, %v3924_v52 }
 0x975   :  { %3122 = vmatpush3.msk.msra.mxu0 %vm862_vm7, %v3924_v52 }
 0x976   :  { %3124 = vmatmul.mubr.msk.f32.vlgmr.msra.gmra.mrb[12].mxu0 %vm849_vm6, %v2791_v53 }
 0x977   :  { %3126 = vmatprep.mubr.msk.f32.mxu0 %vm849_vm6, %v2792_v54 }
 0x97a   :  { %3127 = vmatmul.mubr.msk.f32.gmra.mrb[14].mxu0 %vm849_vm6, %v2793_v51 }
 0x97b   :  { %3156 = vmatprep.mubr.msk.f32.mxu0 %vm480_vm3, %v1944_v33 }
 0xa49   :  { %v3125_v58 = vpop.f32.mrb[12].mxu0 }
 0xa4a   :  { %v3316_v59 = vadd.f32 %v3125_v58, %v161_v56  ;;  %v1664_v60 = vpop.f32.mrb[13].mxu0 }
 0xa4b   :  { %v3317_v61 = vadd.f32 %v1664_v60, %v156_v57 }
 0xa4c   :  { %v1684_v62 = vmax.f32 %v3316_v59, 0.0 }
 0xa4d   :  { %v1683_v0 = vmax.f32 %v3317_v61, 0.0  ;;  %v3128_v1 = vpop.f32.mrb[14].mxu0 }
 0xa4e   :  { %v3318_v3 = vadd.f32 %v3128_v1, %v171_v63  ;;  %v1674_v5 = vpop.f32.mrb[15].mxu0 }
 0xa4f   :  { %v3262_v6 = vpack.c.bf16 %v1684_v62, %v1683_v0  ;;  %v3319_v7 = vadd.f32 %v1674_v5, %v166_v2 }
 0xa50   :  { %v1686_v8 = vmax.f32 %v3318_v3, 0.0 }
 0xa51   :  { %v1685_v9 = vmax.f32 %v3319_v7, 0.0  ;;  %3263 = vmatprep.subr.bf16.mxu1 %v3262_v6 }
 0xa52   :  { %3265 = vmatpush3.bf16.msra.mxu1 %v3262_v6 }
 0xa53   :  { %v3266_v10 = vpack.c.bf16 %v1686_v8, %v1685_v9 }
 0xa55   :  { %3267 = vmatprep.subr.bf16.mxu1 %v3266_v10 }
 0xa56   :  { %3269 = vmatpush3.bf16.msra.mxu1 %v3266_v10 }
 0xa57   :  { %3270 = vmatprep.subr.bf16.mxu1 %v3444_v44 }
 0xa59   :  { %3138 = vmatmul.mubr.msk.f32.vlgmr.msra.gmra.mrb[18].mxu1 %vm616_vm4, %v2800_v11 }
 0xa5a   :  { %3140 = vmatprep.mubr.msk.f32.mxu1 %vm616_vm4, %v2801_v12 }
 0xa5d   :  { %3141 = vmatmul.mubr.msk.f32.gmra.mrb[20].mxu1 %vm616_vm4, %v2802_v13 }
 0xa5e   :  { %3151 = vmatprep.mubr.msk.f32.mxu1 %vm3445_vm5, %v3446_v45 }
 0xb2c   :  { %v3139_v16 = vpop.f32.mrb[18].mxu1 }
 0xb2d   :  { %v1801_v17 = vadd.f32 %v3139_v16, %v1705_v14  ;;  %v1795_v18 = vpop.f32.mrb[19].mxu1 }
 0xb2e   :  { %v1796_v20 = vadd.f32 %v1795_v18, %v1700_v15 }
 0xb2f   :  { %v1815_v21 = vmax.f32 %v1801_v17, 0.0 }
 0xb30   :  { %v1814_v22 = vmax.f32 %v1796_v20, 0.0  ;;  %v3142_v23 = vpop.f32.mrb[20].mxu1 }
 0xb31   :  { %v1811_v25 = vadd.f32 %v3142_v23, %v1715_v4  ;;  %v1805_v26 = vpop.f32.mrb[21].mxu1  ;;  %v1946_v4 = vld [vmem:[%s4073_s4 + $0x10] sm:$0xff]  ;;  %v101_v23 = vpop.permute.xlu1 %100 }
 0xb32   :  { %v3271_v27 = vpack.c.bf16 %v1815_v21, %v1814_v22  ;;  %v1806_v28 = vadd.f32 %v1805_v26, %v1710_v24  ;;  %v1945_v21 = vld [vmem:[%s4073_s4 + $0x8] sm:$0xff]  ;;  %v2052_v22 = vld [vmem:[%s4075_s6] sm:$0xff]  ;;  %v96_v24 = vpop.permute.xlu0 %95 }
 0xb33   :  { %v1817_v29 = vmax.f32 %v1811_v25, 0.0 }
 0xb34   :  { %v1816_v30 = vmax.f32 %v1806_v28, 0.0  ;;  %3272 = vmatpush3.bf16.msra.mxu1 %v3271_v27 }
 0xb35   :  { %3273 = vmatprep.subr.bf16.mxu1 %v3444_v44 }
 0xb36   :  { %v3274_v31 = vpack.c.bf16 %v1817_v29, %v1816_v30  ;;  %v111_v30 = vpop.permute.xlu1 %110  ;;  %v106_v33 = vpop.permute.xlu0 %105 }
 0xb38   :  { %3275 = vmatpush3.bf16.msra.mxu1 %v3274_v31 }
 0xb3b   :  { %3152 = vmatmul.mubr.msk.f32.vlgmr.msra.gmra.mrb[22].mxu1 %vm616_vm4, %v2811_v32 }
 0xb3c   :  { %3170 = vmatprep.mubr.msk.f32.mxu1 %vm616_vm4, %v2052_v22 }
 0xc0e   :  { %v1896_v35 = vpop.f32.mrb[22].mxu1 }
 0xc0f   :  { %v1897_v36 = vadd.f32 %v1896_v35, %v1825_v34  ;;  %v3153_v37 = vpop.f32.mrb[23].mxu1 }
 0xc11   :  { %v1904_v38 = vmul.f32 0.71428573, %v1897_v36  ;;  %v1901_v16 = vrot.slane %v1897_v36, 2 }
 0xc13   :  { %v1905_v39 = vmul.f32 %v1904_v38, %v1904_v38  ;;  %v1903_v17 = vsub.f32 %v3877_v19, %v1901_v16  ;;  %v1947_v19 = vld [vmem:[%s4073_s4 + $0x18] sm:$0xff] }
 0xc15   :  { %v1906_v40 = vadd.f32 1.0, %v1905_v39 }
 0xc17   :  { %3389 = vrsqrt.f32 %v1906_v40 }
 0xc21   :  { %v3390_v41 = vpop.eup %3389 }
 0xc22   :  { %v1908_v42 = vadd.f32 1.0, %v3390_v41  ;;  %v1913_v49 = vmul.f32 %v3390_v41, %v1904_v38  ;;  %v2053_v41 = vld [vmem:[%s4075_s6 + $0x8] sm:$0xff] }
 0xc24   :  { %3391 = vrcp.f32 %v1908_v42 }
 0xc2e   :  { %v3392_v43 = vpop.eup %3391 }
 0xc2f   :  { %v1910_v46 = vmul.f32 %v3392_v43, %v1908_v42  ;;  %v2054_v42 = vld [vmem:[%s4075_s6 + $0x10] sm:$0xff] }
 0xc31   :  { %v1911_v47 = vsub.f32 2.0, %v1910_v46  ;;  %v2068_v46 = vpop.permute.xlu1 %2067 }
 0xc33   :  { %v1912_v48 = vmul.f32 %v3392_v43, %v1911_v47  ;;  %v2055_v43 = vld [vmem:[%s4075_s6 + $0x18] sm:$0xff]  ;;  %v2063_v47 = vpop.permute.xlu0 %2062 }
 0xc35   :  { %v1914_v50 = vmul.f32 %v1913_v49, %v1912_v48 }
 0xc37   :  { %v1915_v53 = vmul.f32 %v1914_v50, %v1914_v50 }
 0xc39   :  { %v1916_v54 = vadd.f32 1.0, %v1915_v53 }
 0xc3b   :  { %3393 = vrsqrt.f32 %v1916_v54 }
 0xc45   :  { %v3394_v51 = vpop.eup %3393 }
 0xc46   :  { %v1918_v55 = vadd.f32 1.0, %v3394_v51  ;;  %v1923_v60 = vmul.f32 %v3394_v51, %v1914_v50  ;;  %v2078_v51 = vpop.permute.xlu1 %2077 }
 0xc48   :  { %3395 = vrcp.f32 %v1918_v55 }
 0xc52   :  { %v3396_v56 = vpop.eup %3395 }
 0xc53   :  { %v1920_v57 = vmul.f32 %v3396_v56, %v1918_v55 }
 0xc55   :  { %v1921_v58 = vsub.f32 2.0, %v1920_v57  ;;  %v2073_v57 = vpop.permute.xlu0 %2072 }
 0xc57   :  { %v1922_v59 = vmul.f32 %v3396_v56, %v1921_v58 }
 0xc59   :  { %v1924_v61 = vmul.f32 %v1923_v60, %v1922_v59 }
 0xc5b   :  { %v1925_v62 = vmul.f32 %v1924_v61, %v1924_v61 }
 0xc5d   :  { %v1926_v63 = vmul.f32 0.07692308, %v1925_v62 }
 0xc5f   :  { %v2814_v0 = vadd.f32 -0.09090909, %v1926_v63 }
 0xc61   :  { %v1928_v1 = vmul.f32 %v2814_v0, %v1925_v62 }
 0xc63   :  { %v1929_v2 = vadd.f32 0.11111111, %v1928_v1  ;;  %v2181_v1 = vld [vmem:[%s4077_s8] sm:$0x3f] }
 0xc65   :  { %v1930_v3 = vmul.f32 %v1929_v2, %v1925_v62  ;;  %v2305_v2 = vld [vmem:[%s4074_s5] sm:$0xff] }
 0xc67   :  { %v2815_v5 = vadd.f32 -0.14285715, %v1930_v3  ;;  %v2186_v3 = vpop.permute.xlu0 %2185 }
 0xc69   :  { %v1932_v6 = vmul.f32 %v2815_v5, %v1925_v62 }
 0xc6b   :  { %v1933_v7 = vadd.f32 0.2, %v1932_v6 }
 0xc6d   :  { %v1934_v8 = vmul.f32 %v1933_v7, %v1925_v62 }
 0xc6f   :  { %v2816_v9 = vadd.f32 -0.33333334, %v1934_v8 }
 0xc71   :  { %v1936_v10 = vmul.f32 %v2816_v9, %v1925_v62 }
 0xc73   :  { %v1937_v11 = vadd.f32 1.0, %v1936_v10 }
 0xc75   :  { %v1938_v12 = vmul.f32 %v1937_v11, %v1924_v61 }
 0xc77   :  { %v1939_v13 = vmul.f32 4.0, %v1938_v12 }
 0xc79   :  { %v1940_v14 = vmul.f32 -0.8904, %v1939_v13 }
 0xc7b   :  { %v1941_v15 = vmul.f32 1.442695, %v1940_v14 }
 0xc7d   :  { %3397 = vpow2.f32 %v1941_v15 }
 0xc87   :  { %v3398_v18 = vpop.eup %3397 }
 0xc88   :  { %v3971_v20 = vmul.f32 %v3398_v18, %v1903_v17 }
 0xc8a   :  { %3154 = vmatprep.subr.msk.mxu0 %vm493_vm2, %v3971_v20 }
 0xc8b   :  { %3155 = vmatpush3.msk.msra.mxu0 %vm493_vm2, %v3971_v20 }
 0xc8c   :  { %3157 = vmatmul.mubr.msk.f32.vlgmr.msra.gmra.mrb[0].mxu0 %vm480_vm3, %v1945_v21 }
 0xc8d   :  { %3159 = vmatprep.mubr.msk.f32.mxu0 %vm480_vm3, %v1946_v4 }
 0xc90   :  { %3160 = vmatmul.mubr.msk.f32.gmra.mrb[2].mxu0 %vm480_vm3, %v1947_v19 }
 0xc91   :  { %3189 = vmatprep.mubr.msk.f32.mxu0 %vm849_vm6, %v2305_v2 }
 0xd5f   :  { %v3158_v25 = vpop.f32.mrb[0].mxu0 }
 0xd60   :  { %v3304_v26 = vadd.f32 %v3158_v25, %v101_v23  ;;  %v2029_v27 = vpop.f32.mrb[1].mxu0 }
 0xd61   :  { %v3305_v28 = vadd.f32 %v2029_v27, %v96_v24 }
 0xd62   :  { %v2049_v29 = vmax.f32 %v3304_v26, 0.0 }
 0xd63   :  { %v2048_v31 = vmax.f32 %v3305_v28, 0.0  ;;  %v3161_v32 = vpop.f32.mrb[2].mxu0 }
 0xd64   :  { %v3306_v34 = vadd.f32 %v3161_v32, %v111_v30  ;;  %v2039_v35 = vpop.f32.mrb[3].mxu0 }
 0xd65   :  { %v3276_v36 = vpack.c.bf16 %v2049_v29, %v2048_v31  ;;  %v3307_v37 = vadd.f32 %v2039_v35, %v106_v33 }
 0xd66   :  { %v2051_v38 = vmax.f32 %v3306_v34, 0.0 }
 0xd67   :  { %v2050_v39 = vmax.f32 %v3307_v37, 0.0  ;;  %3277 = vmatprep.subr.bf16.mxu1 %v3276_v36 }
 0xd68   :  { %3279 = vmatpush3.bf16.msra.mxu1 %v3276_v36 }
 0xd69   :  { %v3280_v40 = vpack.c.bf16 %v2051_v38, %v2050_v39 }
 0xd6b   :  { %3281 = vmatprep.subr.bf16.mxu1 %v3280_v40 }
 0xd6c   :  { %3283 = vmatpush3.bf16.msra.mxu1 %v3280_v40 }
 0xd6d   :  { %3284 = vmatprep.subr.bf16.mxu1 %v3444_v44 }
 0xd6f   :  { %3171 = vmatmul.mubr.msk.f32.vlgmr.msra.gmra.mrb[24].mxu1 %vm616_vm4, %v2053_v41 }
 0xd70   :  { %3173 = vmatprep.mubr.msk.f32.mxu1 %vm616_vm4, %v2054_v42 }
 0xd73   :  { %3174 = vmatmul.mubr.msk.f32.gmra.mrb[26].mxu1 %vm616_vm4, %v2055_v43 }
 0xd74   :  { %3184 = vmatprep.mubr.msk.f32.mxu1 %vm3445_vm5, %v3446_v45 }
 0xe42   :  { %v3172_v48 = vpop.f32.mrb[24].mxu1 }
 0xe43   :  { %v2164_v49 = vadd.f32 %v3172_v48, %v2068_v46  ;;  %v2158_v50 = vpop.f32.mrb[25].mxu1 }
 0xe44   :  { %v2159_v53 = vadd.f32 %v2158_v50, %v2063_v47 }
 0xe45   :  { %v2178_v54 = vmax.f32 %v2164_v49, 0.0 }
 0xe46   :  { %v2177_v55 = vmax.f32 %v2159_v53, 0.0  ;;  %v3175_v56 = vpop.f32.mrb[26].mxu1 }
 0xe47   :  { %v2174_v58 = vadd.f32 %v3175_v56, %v2078_v51  ;;  %v2168_v59 = vpop.f32.mrb[27].mxu1  ;;  %v2307_v51 = vld [vmem:[%s4074_s5 + $0x10] sm:$0xff]  ;;  %v121_v56 = vpop.permute.xlu0 %120 }
 0xe48   :  { %v3285_v60 = vpack.c.bf16 %v2178_v54, %v2177_v55  ;;  %v2169_v61 = vadd.f32 %v2168_v59, %v2073_v57  ;;  %v2306_v54 = vld [vmem:[%s4074_s5 + $0x8] sm:$0xff]  ;;  %v2835_v55 = vld [vmem:[%s4075_s6 + $0x20] sm:$0xff]  ;;  %v116_v57 = vpop.permute.xlu1 %115 }
 0xe49   :  { %v2180_v62 = vmax.f32 %v2174_v58, 0.0 }
 0xe4a   :  { %v2179_v63 = vmax.f32 %v2169_v61, 0.0  ;;  %3286 = vmatpush3.bf16.msra.mxu1 %v3285_v60 }
 0xe4b   :  { %3287 = vmatprep.subr.bf16.mxu1 %v3444_v44 }
 0xe4c   :  { %v3288_v0 = vpack.c.bf16 %v2180_v62, %v2179_v63  ;;  %v131_v63 = vpop.permute.xlu0 %130  ;;  %v126_v2 = vpop.permute.xlu1 %125 }
 0xe4e   :  { %3289 = vmatpush3.bf16.msra.mxu1 %v3288_v0 }
 0xe51   :  { %3185 = vmatmul.mubr.msk.f32.vlgmr.msra.gmra.mrb[28].mxu1 %vm616_vm4, %v2181_v1 }
 0xe52   :  { %3203 = vmatprep.mubr.msk.f32.mxu1 %vm616_vm4, %v2835_v55 }
 0xf24   :  { %v2257_v5 = vpop.f32.mrb[28].mxu1 }
 0xf25   :  { %v2258_v6 = vadd.f32 %v2257_v5, %v2186_v3  ;;  %v3186_v7 = vpop.f32.mrb[29].mxu1 }
 0xf27   :  { %v2265_v8 = vmul.f32 0.71428573, %v2258_v6  ;;  %v2262_v48 = vrot.slane %v2258_v6, 3 }
 0xf29   :  { %v2266_v9 = vmul.f32 %v2265_v8, %v2265_v8  ;;  %v2264_v49 = vsub.f32 %v3924_v52, %v2262_v48  ;;  %v2308_v52 = vld [vmem:[%s4074_s5 + $0x18] sm:$0xff] }
 0xf2b   :  { %v2267_v10 = vadd.f32 1.0, %v2266_v9 }
 0xf2d   :  { %3399 = vrsqrt.f32 %v2267_v10 }
 0xf37   :  { %v3400_v11 = vpop.eup %3399 }
 0xf38   :  { %v2269_v12 = vadd.f32 1.0, %v3400_v11  ;;  %v2274_v17 = vmul.f32 %v3400_v11, %v2265_v8  ;;  %v2836_v11 = vld [vmem:[%s4075_s6 + $0x28] sm:$0xff] }
 0xf3a   :  { %3401 = vrcp.f32 %v2269_v12 }
 0xf44   :  { %v3402_v13 = vpop.eup %3401 }
 0xf45   :  { %v2271_v14 = vmul.f32 %v3402_v13, %v2269_v12  ;;  %v2837_v12 = vld [vmem:[%s4075_s6 + $0x30] sm:$0xff] }
 0xf47   :  { %v2272_v15 = vsub.f32 2.0, %v2271_v14  ;;  %v2431_v14 = vpop.permute.xlu0 %2430 }
 0xf49   :  { %v2273_v16 = vmul.f32 %v3402_v13, %v2272_v15  ;;  %v2838_v13 = vld [vmem:[%s4075_s6 + $0x38] sm:$0xff]  ;;  %v2426_v15 = vpop.permute.xlu1 %2425 }
 0xf4b   :  { %v2275_v18 = vmul.f32 %v2274_v17, %v2273_v16 }
 0xf4d   :  { %v2276_v21 = vmul.f32 %v2275_v18, %v2275_v18 }
 0xf4f   :  { %v2277_v4 = vadd.f32 1.0, %v2276_v21 }
 0xf51   :  { %3403 = vrsqrt.f32 %v2277_v4 }
 0xf5b   :  { %v3404_v19 = vpop.eup %3403 }
 0xf5c   :  { %v2279_v22 = vadd.f32 1.0, %v3404_v19  ;;  %v2284_v27 = vmul.f32 %v3404_v19, %v2275_v18  ;;  %v2441_v19 = vpop.permute.xlu0 %2440 }
 0xf5e   :  { %3405 = vrcp.f32 %v2279_v22 }
 0xf68   :  { %v3406_v23 = vpop.eup %3405 }
 0xf69   :  { %v2281_v24 = vmul.f32 %v3406_v23, %v2279_v22 }
 0xf6b   :  { %v2282_v25 = vsub.f32 2.0, %v2281_v24  ;;  %v2436_v24 = vpop.permute.xlu1 %2435 }
 0xf6d   :  { %v2283_v26 = vmul.f32 %v3406_v23, %v2282_v25 }
 0xf6f   :  { %v2285_v28 = vmul.f32 %v2284_v27, %v2283_v26 }
 0xf71   :  { %v2286_v29 = vmul.f32 %v2285_v28, %v2285_v28 }
 0xf73   :  { %v2287_v30 = vmul.f32 0.07692308, %v2286_v29 }
 0xf75   :  { %v2827_v31 = vadd.f32 -0.09090909, %v2287_v30 }
 0xf77   :  { %v2289_v32 = vmul.f32 %v2827_v31, %v2286_v29  ;;  %v2544_v31 = vld [vmem:[%s4079_s10] sm:$0xf]  ;;  %s3447_s10 = smov [#allocation2]  }
 0xf78   :  { %s2676_s3 = sshll.u32 %s3447_s10, 4  ;;  %s2677_s3 = int_to_ptr.vmem [resolvable:$true] %s2676_s3 }
 0xf79   :  { %v2290_v33 = vadd.f32 0.11111111, %v2289_v32  ;;  %v2549_v32 = vpop.permute.xlu1 %2548  ;;  %s3419_s30 = scalar_lea.vmem %s2677_s3, 128  ;;  %p3424_p1 = scmp.lt.s32.totalorder %s2677_s3, %s2677_s3 }
 0xf7a   :  { %p3420_p0 = scmp.ne.s32.totalorder %s2677_s3, %s3419_s30  ;;  %p3425_p2 = scmp.lt.s32.totalorder %s3419_s30, %s3419_s30 }
 0xf7b   :  { %v2291_v34 = vmul.f32 %v2290_v33, %v2286_v29 }
 0xf7c   :  { %p3426_p3 = por %p3425_p2, %p3424_p1 }
 0xf7d   :  { %v2828_v35 = vadd.f32 -0.14285715, %v2291_v34 }
 0xf7e   :  { %p3427_p4 = pnand %p3426_p3, %p3420_p0 }
 0xf7f   :  { %v2293_v36 = vmul.f32 %v2828_v35, %v2286_v29 }
 0xf81   :  { %v2294_v37 = vadd.f32 0.2, %v2293_v36 }
 0xf83   :  { %v2295_v38 = vmul.f32 %v2294_v37, %v2286_v29 }
 0xf85   :  { %v2829_v39 = vadd.f32 -0.33333334, %v2295_v38 }
 0xf87   :  { %v2297_v40 = vmul.f32 %v2829_v39, %v2286_v29 }
 0xf89   :  { %v2298_v41 = vadd.f32 1.0, %v2297_v40 }
 0xf8b   :  { %v2299_v42 = vmul.f32 %v2298_v41, %v2285_v28 }
 0xf8d   :  { %v2300_v43 = vmul.f32 4.0, %v2299_v42 }
 0xf8f   :  { %v2301_v46 = vmul.f32 -0.8904, %v2300_v43 }
 0xf91   :  { %v2302_v47 = vmul.f32 1.442695, %v2301_v46 }
 0xf93   :  { %3407 = vpow2.f32 %v2302_v47 }
 0xf9d   :  { %v3408_v50 = vpop.eup %3407 }
 0xf9e   :  { %v2304_v53 = vmul.f32 %v3408_v50, %v2264_v49 }
 0xfa0   :  { %2669 = vst [vmem:[#allocation2 + $0x2] sm:$0x7] %v2304_v53  ;;  %3187 = vmatprep.subr.msk.mxu0 %vm862_vm7, %v2304_v53 }
 0xfa1   :  { %3188 = vmatpush3.msk.msra.mxu0 %vm862_vm7, %v2304_v53 }
 0xfa2   :  { %3190 = vmatmul.mubr.msk.f32.vlgmr.msra.gmra.mrb[4].mxu0 %vm849_vm6, %v2306_v54 }
 0xfa3   :  { %3192 = vmatprep.mubr.msk.f32.mxu0 %vm849_vm6, %v2307_v51 }
 0xfa6   :  { %3193 = vmatmul.mubr.msk.f32.gmra.mrb[6].mxu0 %vm849_vm6, %v2308_v52 }
0x1075   :  { %v3191_v58 = vpop.f32.mrb[4].mxu0 }
0x1076   :  { %v3308_v59 = vadd.f32 %v3191_v58, %v121_v56  ;;  %v2390_v60 = vpop.f32.mrb[5].mxu0 }
0x1077   :  { %v3309_v61 = vadd.f32 %v2390_v60, %v116_v57 }
0x1078   :  { %v2410_v62 = vmax.f32 %v3308_v59, 0.0 }
0x1079   :  { %v2409_v0 = vmax.f32 %v3309_v61, 0.0  ;;  %v3194_v1 = vpop.f32.mrb[6].mxu0 }
0x107a   :  { %v3310_v3 = vadd.f32 %v3194_v1, %v131_v63  ;;  %v2400_v5 = vpop.f32.mrb[7].mxu0 }
0x107b   :  { %v3290_v6 = vpack.c.bf16 %v2410_v62, %v2409_v0  ;;  %v3311_v7 = vadd.f32 %v2400_v5, %v126_v2 }
0x107c   :  { %v2412_v8 = vmax.f32 %v3310_v3, 0.0 }
0x107d   :  { %v2411_v9 = vmax.f32 %v3311_v7, 0.0  ;;  %3291 = vmatprep.subr.bf16.mxu1 %v3290_v6 }
0x107e   :  { %3293 = vmatpush3.bf16.msra.mxu1 %v3290_v6 }
0x107f   :  { %v3294_v10 = vpack.c.bf16 %v2412_v8, %v2411_v9 }
0x1081   :  { %3295 = vmatprep.subr.bf16.mxu1 %v3294_v10 }
0x1082   :  { %3297 = vmatpush3.bf16.msra.mxu1 %v3294_v10 }
0x1083   :  { %3298 = vmatprep.subr.bf16.mxu1 %v3444_v44 }
0x1085   :  { %3204 = vmatmul.mubr.msk.f32.vlgmr.msra.gmra.mrb[30].mxu1 %vm616_vm4, %v2836_v11 }
0x1086   :  { %3206 = vmatprep.mubr.msk.f32.mxu1 %vm616_vm4, %v2837_v12 }
0x1089   :  { %3207 = vmatmul.mubr.msk.f32.gmra.mrb[32].mxu1 %vm616_vm4, %v2838_v13 }
0x108a   :  { %3217 = vmatprep.mubr.msk.f32.mxu1 %vm3445_vm5, %v3446_v45 }
0x1158   :  { %v3205_v16 = vpop.f32.mrb[30].mxu1 }
0x1159   :  { %v2527_v17 = vadd.f32 %v3205_v16, %v2431_v14  ;;  %v2521_v18 = vpop.f32.mrb[31].mxu1 }
0x115a   :  { %v2522_v21 = vadd.f32 %v2521_v18, %v2426_v15 }
0x115b   :  { %v2541_v4 = vmax.f32 %v2527_v17, 0.0 }
0x115c   :  { %v2540_v22 = vmax.f32 %v2522_v21, 0.0  ;;  %v3208_v23 = vpop.f32.mrb[32].mxu1 }
0x115d   :  { %v2537_v25 = vadd.f32 %v3208_v23, %v2441_v19  ;;  %v2531_v26 = vpop.f32.mrb[33].mxu1 }
0x115e   :  { %v3299_v27 = vpack.c.bf16 %v2541_v4, %v2540_v22  ;;  %v2532_v28 = vadd.f32 %v2531_v26, %v2436_v24 }
0x115f   :  { %v2543_v29 = vmax.f32 %v2537_v25, 0.0 }
0x1160   :  { %v2542_v30 = vmax.f32 %v2532_v28, 0.0  ;;  %3300 = vmatpush3.bf16.msra.mxu1 %v3299_v27 }
0x1161   :  { %3301 = vmatprep.subr.bf16.mxu1 %v3444_v44 }
0x1162   :  { %v3302_v45 = vpack.c.bf16 %v2543_v29, %v2542_v30 }
0x1164   :  { %3303 = vmatpush3.bf16.msra.mxu1 %v3302_v45 }
0x1167   :  { %3218 = vmatmul.mubr.msk.f32.vlgmr.msra.gmra.mrb[34].mxu1 %vm616_vm4, %v2544_v31 }
0x123a   :  { %v2620_v33 = vpop.f32.mrb[34].mxu1 }
0x123b   :  { %v2621_v34 = vadd.f32 %v2620_v33, %v2549_v32  ;;  %v3219_v35 = vpop.f32.mrb[35].mxu1 }
0x123d   :  { %v2628_v36 = vmul.f32 0.71428573, %v2621_v34  ;;  %v2625_v12 = vrot.slane %v2621_v34, 2 }
0x123f   :  { %v2629_v37 = vmul.f32 %v2628_v36, %v2628_v36  ;;  %v2627_v13 = vsub.f32 %v3971_v20, %v2625_v12 }
0x1241   :  { %v2630_v38 = vadd.f32 1.0, %v2629_v37 }
0x1243   :  { %3409 = vrsqrt.f32 %v2630_v38 }
0x124d   :  { %v3410_v39 = vpop.eup %3409 }
0x124e   :  { %v2632_v40 = vadd.f32 1.0, %v3410_v39  ;;  %v2637_v46 = vmul.f32 %v3410_v39, %v2628_v36 }
0x1250   :  { %3411 = vrcp.f32 %v2632_v40 }
0x125a   :  { %v3412_v44 = vpop.eup %3411 }
0x125b   :  { %v2634_v41 = vmul.f32 %v3412_v44, %v2632_v40 }
0x125d   :  { %v2635_v42 = vsub.f32 2.0, %v2634_v41 }
0x125f   :  { %v2636_v43 = vmul.f32 %v3412_v44, %v2635_v42 }
0x1261   :  { %v2638_v47 = vmul.f32 %v2637_v46, %v2636_v43 }
0x1263   :  { %v2639_v48 = vmul.f32 %v2638_v47, %v2638_v47 }
0x1265   :  { %v2640_v49 = vadd.f32 1.0, %v2639_v48 }
0x1267   :  { %3413 = vrsqrt.f32 %v2640_v49 }
0x1271   :  { %v3414_v50 = vpop.eup %3413 }
0x1272   :  { %v2642_v53 = vadd.f32 1.0, %v3414_v50  ;;  %v2647_v56 = vmul.f32 %v3414_v50, %v2638_v47 }
0x1274   :  { %3415 = vrcp.f32 %v2642_v53 }
0x127e   :  { %v3416_v54 = vpop.eup %3415 }
0x127f   :  { %v2644_v51 = vmul.f32 %v3416_v54, %v2642_v53 }
0x1281   :  { %v2645_v52 = vsub.f32 2.0, %v2644_v51 }
0x1283   :  { %v2646_v55 = vmul.f32 %v3416_v54, %v2645_v52 }
0x1285   :  { %v2648_v57 = vmul.f32 %v2647_v56, %v2646_v55 }
0x1287   :  { %v2649_v58 = vmul.f32 %v2648_v57, %v2648_v57 }
0x1289   :  { %v2650_v59 = vmul.f32 0.07692308, %v2649_v58 }
0x128b   :  { %v2848_v60 = vadd.f32 -0.09090909, %v2650_v59 }
0x128d   :  { %v2652_v61 = vmul.f32 %v2848_v60, %v2649_v58 }
0x128f   :  { %v2653_v62 = vadd.f32 0.11111111, %v2652_v61 }
0x1291   :  { %v2654_v63 = vmul.f32 %v2653_v62, %v2649_v58 }
0x1293   :  { %v2849_v0 = vadd.f32 -0.14285715, %v2654_v63 }
0x1295   :  { %v2656_v1 = vmul.f32 %v2849_v0, %v2649_v58 }
0x1297   :  { %v2657_v2 = vadd.f32 0.2, %v2656_v1 }
0x1299   :  { %v2658_v3 = vmul.f32 %v2657_v2, %v2649_v58 }
0x129b   :  { %v2850_v5 = vadd.f32 -0.33333334, %v2658_v3 }
0x129d   :  { %v2660_v6 = vmul.f32 %v2850_v5, %v2649_v58 }
0x129f   :  { %v2661_v7 = vadd.f32 1.0, %v2660_v6 }
0x12a1   :  { %v2662_v8 = vmul.f32 %v2661_v7, %v2648_v57 }
0x12a3   :  { %v2663_v9 = vmul.f32 4.0, %v2662_v8 }
0x12a5   :  { %v2664_v10 = vmul.f32 -0.8904, %v2663_v9 }
0x12a7   :  { %v2665_v11 = vmul.f32 1.442695, %v2664_v10 }
0x12a9   :  { %3417 = vpow2.f32 %v2665_v11 }
0x12b3   :  { %v3418_v14 = vpop.eup %3417 }
0x12b4   :  { %v2667_v15 = vmul.f32 %v3418_v14, %v2627_v13 }
0x12b6   :  { %2668 = vst [vmem:[#allocation2] sm:$0x3] %v2667_v15 }
0x12b7   :  { %3430 = shalt.err (!%p3427_p4)
}
0x12b8   :  { %s3431_s13 = scalar_lea.hbm %s4081_s12, 128 }
0x12b9   :  { %p3432_p5 = scmp.ne.s32.totalorder %s4081_s12, %s3431_s13  ;;  %p3435_p6 = scmp.lt.u32.totalorder %s3431_s13, %s4081_s12 }
0x12bb   :  { %p3437_p7 = pnand %p3435_p6, %p3432_p5 }
0x12bd   :  { %3440 = shalt.err (!%p3437_p7)
}
0x12be   :  { %2679 = dma.vmem_to_hbm [thread:$0]  %s2677_s3, 128, %s4081_s12, [#allocation3]  }
0x12bf   :  { %3441 = dma.done.wait [#allocation3], 128  }
0x12c0   :  { %3442 = vsyncadd [#allocation3], 4294967168 }
0x12c1   :  { %2683 = vsyncpa [#allocation3], 1 }

</bundles_post_ra>
